<compile_context>
chip_gen: v7x
topology: tpu7x:2x2x1
jax: 0.10.0
libtpu: 0.0.40
codegen_flags: <defaults>
</compile_context>

<pallas_src>
import functools

import jax
import jax.numpy as jnp
from jax.experimental import pallas as pl
from jax.experimental.pallas import tpu as pltpu

LANE = 128


def _round_up(v, m):
    return (v + m - 1) // m * m


# ----------------------------------------------------------------------------
# One SAGEConv layer:  out_i = act( (1/deg_i) * sum_k A[i,k] * U[k]
#                                   + X_i @ W_r + b )
#   grid = (row_tile i  [parallel],  reduction tile k  [arbitrary])
# ----------------------------------------------------------------------------
def _sage_conv_kernel(adj_ref, u_ref, xi_ref, wr_ref, b_ref, invdeg_ref,
                      out_ref, acc_ref, *, activation):
    k = pl.program_id(1)

    @pl.when(k == 0)
    def _():
        acc_ref[...] = jnp.zeros_like(acc_ref)

    # int8 0/1 (edge-count) adjacency tile -> bf16 MXU operand.  HBM streams
    # only 1 byte/entry; the exact f32 row scale (1/deg) is applied at finalize.
    a = adj_ref[...].astype(jnp.float32).astype(jnp.bfloat16)
    acc_ref[...] += jnp.dot(a, u_ref[...], preferred_element_type=jnp.float32)

    @pl.when(k == pl.num_programs(1) - 1)
    def _():
        y = acc_ref[...] * invdeg_ref[...]                 # exact mean (f32)
        y = y + jnp.dot(xi_ref[...], wr_ref[...],          # self term
                        preferred_element_type=jnp.float32)
        y = y + b_ref[...]                                 # bias (f32)
        if activation == "relu":
            # TODO(synk): training-mode dropout(p=0.5) would mask here using
            # pltpu.prng_seed / pltpu.prng_random_bits; eval mode is identity.
            out_ref[...] = jnp.maximum(y, 0.0).astype(out_ref.dtype)
        else:  # log_softmax; padded lanes already carry -1e30 baked into b
            m = jnp.max(y, axis=-1, keepdims=True)
            s = y - m
            lse = jnp.log(jnp.sum(jnp.exp(s), axis=-1, keepdims=True))
            out_ref[...] = (s - lse).astype(out_ref.dtype)


def _conv_layer(adj_i8, u, xi, wr, b, inv_deg, *, out_dtype, activation,
                tm, tk):
    n_pad = adj_i8.shape[0]
    cp_in = xi.shape[1]
    cp_out = u.shape[1]
    grid = (n_pad // tm, n_pad // tk)

    kernel = functools.partial(_sage_conv_kernel, activation=activation)
    return pl.pallas_call(
        kernel,
        out_shape=jax.ShapeDtypeStruct((n_pad, cp_out), out_dtype),
        grid_spec=pltpu.PrefetchScalarGridSpec(
            num_scalar_prefetch=0,
            grid=grid,
            in_specs=[
                pl.BlockSpec((tm, tk), lambda i, k: (i, k)),        # adjacency
                pl.BlockSpec((tk, cp_out), lambda i, k: (k, 0)),    # U = X @ W_l
                pl.BlockSpec((tm, cp_in), lambda i, k: (i, 0)),     # self feats
                pl.BlockSpec((cp_in, cp_out), lambda i, k: (0, 0)),  # W_r
                pl.BlockSpec((1, cp_out), lambda i, k: (0, 0)),      # bias
                pl.BlockSpec((tm, 1), lambda i, k: (i, 0)),          # 1/deg
            ],
            out_specs=pl.BlockSpec((tm, cp_out), lambda i, k: (i, 0)),
            scratch_shapes=[pltpu.VMEM((tm, cp_out), jnp.float32)]),
        compiler_params=pltpu.CompilerParams(
            # Row tiles are independent (no cross-row scratch any more) ->
            # "parallel" unlocks megacore / v7x dual-TC; k carries the
            # accumulator -> "arbitrary".
            dimension_semantics=("parallel", "arbitrary"),
            # Per-step buffers are tiny (<1 MiB double-buffered); 32 MiB is
            # safe on every generation incl. v7x's 64 MiB VMEM.
            vmem_limit_bytes=32 * 1024 * 1024),
    )(adj_i8, u, xi, wr, b, inv_deg)


# ----------------------------------------------------------------------------
# Wrapper: build int8 adjacency + f32 degrees, fold W_l into streamed features,
# pad to lane-friendly shapes, run the two layer kernels.
# ----------------------------------------------------------------------------
def sage_forward(params, x, edge_index, *, tm=256, tk=256):
    # tm=tk=256 fills the v6e/v7x 256x256 MXU and halves grid-step overhead;
    # on v5e (4x128^2 MXU) 128x128 tiles would be equivalent.
    n, c_in = x.shape
    hidden = params["conv1"]["w_l"].shape[1]
    c_out = params["conv2"]["w_l"].shape[1]

    n_pad = _round_up(n, max(tm, tk))
    assert n_pad % tm == 0 and n_pad % tk == 0
    cp_in = _round_up(c_in, LANE)
    cp_h = _round_up(hidden, LANE)
    cp_out = _round_up(c_out, LANE)

    # Dense edge-count adjacency (int8, unnormalized) + exact f32 1/deg.
    # TODO(synk): for large graphs a scalar-prefetch CSR gather kernel should
    # replace this O(N^2) densification.
    src, dst = edge_index[0], edge_index[1]
    counts = jnp.zeros((n, n), jnp.float32).at[dst, src].add(1.0)
    deg = jnp.sum(counts, axis=1, keepdims=True)
    inv_deg = 1.0 / jnp.maximum(deg, 1.0)
    adj_i8 = jnp.zeros((n_pad, n_pad), jnp.int8)
    adj_i8 = adj_i8.at[:n, :n].set(counts.astype(jnp.int8))
    inv_deg_p = jnp.ones((n_pad, 1), jnp.float32).at[:n, :].set(inv_deg)

    def pad2(a, rows, cols, dtype):
        buf = jnp.zeros((rows, cols), dtype)
        return buf.at[:a.shape[0], :a.shape[1]].set(a.astype(dtype))

    # ---- layer 1: conv1 + relu ----------------------------------------------
    u1 = pad2(x @ params["conv1"]["w_l"], n_pad, cp_h, jnp.bfloat16)
    xi1 = pad2(x, n_pad, cp_in, jnp.bfloat16)
    wr1 = pad2(params["conv1"]["w_r"], cp_in, cp_h, jnp.bfloat16)
    b1 = pad2(params["conv1"]["b"].reshape(1, -1), 1, cp_h, jnp.float32)

    h = _conv_layer(adj_i8, u1, xi1, wr1, b1, inv_deg_p,
                    out_dtype=jnp.bfloat16, activation="relu", tm=tm, tk=tk)
    # dropout(p=0.5) in eval mode is identity.

    # ---- layer 2: conv2 + log_softmax ---------------------------------------
    wl2 = pad2(params["conv2"]["w_l"], cp_h, cp_out, jnp.float32)
    u2 = (h.astype(jnp.float32) @ wl2).astype(jnp.bfloat16)   # reassociated W_l2
    wr2 = pad2(params["conv2"]["w_r"], cp_h, cp_out, jnp.bfloat16)
    # Bake the lane-padding softmax mask into the bias (no in-kernel iota/select).
    b2 = jnp.full((1, cp_out), -1e30, jnp.float32)
    b2 = b2.at[:, :c_out].set(params["conv2"]["b"].reshape(1, -1))

    logp = _conv_layer(adj_i8, u2, h, wr2, b2, inv_deg_p,
                       out_dtype=jnp.float32, activation="log_softmax",
                       tm=tm, tk=tk)
    return logp[:n, :c_out]


# ----------------------------------------------------------------------------
# Parameters + pure-JAX reference (for a correctness check in __main__)
# ----------------------------------------------------------------------------
def init_sage_params(key, in_channels, hidden, out_channels):
    ks = jax.random.split(key, 4)

    def lin(k, cin, cout):
        scale = 1.0 / jnp.sqrt(cin)
        return jax.random.uniform(k, (cin, cout), jnp.float32,
                                  minval=-scale, maxval=scale)

    return {
        "conv1": {"w_l": lin(ks[0], in_channels, hidden),
                  "w_r": lin(ks[1], in_channels, hidden),
                  "b": jnp.zeros((hidden,), jnp.float32)},
        "conv2": {"w_l": lin(ks[2], hidden, out_channels),
                  "w_r": lin(ks[3], hidden, out_channels),
                  "b": jnp.zeros((out_channels,), jnp.float32)},
    }


def sage_reference(params, x, edge_index):
    n = x.shape[0]
    src, dst = edge_index[0], edge_index[1]
    adj = jnp.zeros((n, n), jnp.float32).at[dst, src].add(1.0)
    deg = jnp.sum(adj, axis=1, keepdims=True)
    adj = adj / jnp.maximum(deg, 1.0)
    h = (adj @ x) @ params["conv1"]["w_l"] + x @ params["conv1"]["w_r"] \
        + params["conv1"]["b"]
    h = jnp.maximum(h, 0.0)
    o = (adj @ h) @ params["conv2"]["w_l"] + h @ params["conv2"]["w_r"] \
        + params["conv2"]["b"]
    return jax.nn.log_softmax(o, axis=1)


if __name__ == "__main__":
    key = jax.random.PRNGKey(0)
    k_x, k_e, k_p = jax.random.split(key, 3)

    num_nodes = 16
    in_channels = 8
    hidden = 16          # fixed by the module: SAGEConv(in_channels, 16)
    out_channels = 4
    num_edges = 40

    x = jax.random.normal(k_x, (num_nodes, in_channels), jnp.float32)
    edge_index = jax.random.randint(k_e, (2, num_edges), 0, num_nodes,
                                    dtype=jnp.int32)
    params = init_sage_params(k_p, in_channels, hidden, out_channels)

    out = jax.jit(sage_forward)(params, x, edge_index)
    out = jax.block_until_ready(out)

    assert out.shape == (num_nodes, out_channels)
    assert bool(jnp.all(jnp.isfinite(out)))
    # log_softmax rows must sum (in prob space) to 1
    assert jnp.allclose(jnp.sum(jnp.exp(out), axis=1), 1.0, atol=1e-4)
    # matches the plain-JAX f32 reference (bf16 MXU operands -> loose tol)
    ref = sage_reference(params, x, edge_index)
    assert jnp.allclose(out, ref, atol=1e-1)
    print("KERNEL_OK")
</pallas_src>

<mosaic_0001>
module attributes {stable_mosaic.version = 11 : i64} {
  func.func @_sage_conv_kernel(%arg0: i32, %arg1: i32, %arg2: memref<256x256xi8, #tpu.memory_space<vmem>>, %arg3: memref<256x128xbf16, #tpu.memory_space<vmem>>, %arg4: memref<256x128xbf16, #tpu.memory_space<vmem>>, %arg5: memref<128x128xbf16, #tpu.memory_space<vmem>>, %arg6: memref<1x128xf32, #tpu.memory_space<vmem>>, %arg7: memref<256x1xf32, #tpu.memory_space<vmem>>, %arg8: memref<256x128xbf16, #tpu.memory_space<vmem>>, %arg9: memref<256x128xf32, #tpu.memory_space<vmem>>) attributes {dimension_semantics = [#tpu.dimension_semantics<parallel>, #tpu.dimension_semantics<arbitrary>], iteration_bounds = array<i64: 1, 1>, scalar_prefetch = 0 : i64, scratch_operands = 1 : i64, tpu.core_type = #tpu.core_type<tc>, window_params = [{transform_indices = @transform_0, window_bounds = array<i64: 256, 256>}, {transform_indices = @transform_1, window_bounds = array<i64: 256, 128>}, {transform_indices = @transform_2, window_bounds = array<i64: 256, 128>}, {pipeline_mode = #tpu.pipeline_mode<synchronous>, transform_indices = @transform_3, window_bounds = array<i64: 128, 128>}, {pipeline_mode = #tpu.pipeline_mode<synchronous>, transform_indices = @transform_4, window_bounds = array<i64: 1, 128>}, {transform_indices = @transform_5, window_bounds = array<i64: 256, 1>}, {transform_indices = @transform_6, window_bounds = array<i64: 256, 128>}]} {
    %c0_i32 = arith.constant 0 : i32
    %0 = arith.cmpi eq, %arg1, %c0_i32 : i32
    %1 = arith.extui %0 : i1 to i32
    %c0_i32_0 = arith.constant 0 : i32
    %2 = arith.cmpi ne, %1, %c0_i32_0 : i32
    scf.if %2 {
      %cst_10 = arith.constant 0.000000e+00 : f32
      %14 = vector.broadcast %cst_10 : f32 to vector<256x128xf32>
      %c0_11 = arith.constant 0 : index
      %c0_12 = arith.constant 0 : index
      %15 = vector.load %arg9[%c0_11, %c0_12] : memref<256x128xf32, #tpu.memory_space<vmem>>, vector<256x128xf32>
      tpu.vector_store %arg9[%c0_11, %c0_12], %14 {strides = array<i32>} : memref<256x128xf32, #tpu.memory_space<vmem>>, vector<256x128xf32>,
    } else {
    }
    %c0 = arith.constant 0 : index
    %c0_1 = arith.constant 0 : index
    %3 = vector.load %arg2[%c0, %c0_1] : memref<256x256xi8, #tpu.memory_space<vmem>>, vector<256x256xi8>
    %4 = arith.sitofp %3 : vector<256x256xi8> to vector<256x256xf32>
    %5 = arith.truncf %4 : vector<256x256xf32> to vector<256x256xbf16>
    %c0_2 = arith.constant 0 : index
    %c0_3 = arith.constant 0 : index
    %6 = vector.load %arg9[%c0_2, %c0_3] : memref<256x128xf32, #tpu.memory_space<vmem>>, vector<256x128xf32>
    %c0_4 = arith.constant 0 : index
    %c0_5 = arith.constant 0 : index
    %7 = vector.load %arg3[%c0_4, %c0_5] : memref<256x128xbf16, #tpu.memory_space<vmem>>, vector<256x128xbf16>
    %cst = arith.constant dense<0.000000e+00> : vector<256x128xf32>
    %8 = tpu.matmul %5, %7, %cst {dimension_numbers = #tpu.dot_dimension_numbers<[1], [0], [0], [1], [0, 0, 1, 1], [], []>} : vector<256x256xbf16>, vector<256x128xbf16>, vector<256x128xf32> -> vector<256x128xf32>
    %9 = arith.addf %6, %8 : vector<256x128xf32>
    %c0_6 = arith.constant 0 : index
    %c0_7 = arith.constant 0 : index
    %10 = vector.load %arg9[%c0_6, %c0_7] : memref<256x128xf32, #tpu.memory_space<vmem>>, vector<256x128xf32>
    tpu.vector_store %arg9[%c0_6, %c0_7], %9 {strides = array<i32>} : memref<256x128xf32, #tpu.memory_space<vmem>>, vector<256x128xf32>,
    %c0_i32_8 = arith.constant 0 : i32
    %11 = arith.cmpi eq, %arg1, %c0_i32_8 : i32
    %12 = arith.extui %11 : i1 to i32
    %c0_i32_9 = arith.constant 0 : i32
    %13 = arith.cmpi ne, %12, %c0_i32_9 : i32
    scf.if %13 {
      %c0_10 = arith.constant 0 : index
      %c0_11 = arith.constant 0 : index
      %14 = vector.load %arg9[%c0_10, %c0_11] : memref<256x128xf32, #tpu.memory_space<vmem>>, vector<256x128xf32>
      %c0_12 = arith.constant 0 : index
      %c0_13 = arith.constant 0 : index
      %15 = vector.load %arg7[%c0_12, %c0_13] : memref<256x1xf32, #tpu.memory_space<vmem>>, vector<256x1xf32>
      %16 = vector.broadcast %15 : vector<256x1xf32> to vector<256x128xf32>
      %17 = arith.mulf %14, %16 : vector<256x128xf32>
      %c0_14 = arith.constant 0 : index
      %c0_15 = arith.constant 0 : index
      %18 = vector.load %arg4[%c0_14, %c0_15] : memref<256x128xbf16, #tpu.memory_space<vmem>>, vector<256x128xbf16>
      %c0_16 = arith.constant 0 : index
      %c0_17 = arith.constant 0 : index
      %19 = vector.load %arg5[%c0_16, %c0_17] : memref<128x128xbf16, #tpu.memory_space<vmem>>, vector<128x128xbf16>
      %cst_18 = arith.constant dense<0.000000e+00> : vector<256x128xf32>
      %20 = tpu.matmul %18, %19, %cst_18 {dimension_numbers = #tpu.dot_dimension_numbers<[1], [0], [0], [1], [0, 0, 1, 1], [], []>} : vector<256x128xbf16>, vector<128x128xbf16>, vector<256x128xf32> -> vector<256x128xf32>
      %21 = arith.addf %17, %20 : vector<256x128xf32>
      %c0_19 = arith.constant 0 : index
      %c0_20 = arith.constant 0 : index
      %22 = vector.load %arg6[%c0_19, %c0_20] : memref<1x128xf32, #tpu.memory_space<vmem>>, vector<1x128xf32>
      %23 = vector.broadcast %22 : vector<1x128xf32> to vector<256x128xf32>
      %24 = arith.addf %21, %23 : vector<256x128xf32>
      %cst_21 = arith.constant 0.000000e+00 : f32
      %25 = vector.broadcast %cst_21 : f32 to vector<256x128xf32>
      %26 = arith.maximumf %24, %25 : vector<256x128xf32>
      %27 = arith.truncf %26 : vector<256x128xf32> to vector<256x128xbf16>
      %c0_22 = arith.constant 0 : index
      %c0_23 = arith.constant 0 : index
      %28 = vector.load %arg8[%c0_22, %c0_23] : memref<256x128xbf16, #tpu.memory_space<vmem>>, vector<256x128xbf16>
      tpu.vector_store %arg8[%c0_22, %c0_23], %27 {strides = array<i32>} : memref<256x128xbf16, #tpu.memory_space<vmem>>, vector<256x128xbf16>,
    } else {
    }
    return
  }
  func.func @transform_0(%arg0: i32, %arg1: i32) -> (i32, i32) {
    %c0_i32 = arith.constant 0 : i32
    return %arg0, %arg1 : i32, i32
  }
  func.func @transform_1(%arg0: i32, %arg1: i32) -> (i32, i32) {
    %c0_i32 = arith.constant 0 : i32
    %c0_i32_0 = arith.constant 0 : i32
    return %arg1, %c0_i32 : i32, i32
  }
  func.func @transform_2(%arg0: i32, %arg1: i32) -> (i32, i32) {
    %c0_i32 = arith.constant 0 : i32
    %c0_i32_0 = arith.constant 0 : i32
    return %arg0, %c0_i32 : i32, i32
  }
  func.func @transform_3(%arg0: i32, %arg1: i32) -> (i32, i32) {
    %c0_i32 = arith.constant 0 : i32
    %c0_i32_0 = arith.constant 0 : i32
    %c0_i32_1 = arith.constant 0 : i32
    return %c0_i32, %c0_i32_0 : i32, i32
  }
  func.func @transform_4(%arg0: i32, %arg1: i32) -> (i32, i32) {
    %c0_i32 = arith.constant 0 : i32
    %c0_i32_0 = arith.constant 0 : i32
    %c0_i32_1 = arith.constant 0 : i32
    return %c0_i32, %c0_i32_0 : i32, i32
  }
  func.func @transform_5(%arg0: i32, %arg1: i32) -> (i32, i32) {
    %c0_i32 = arith.constant 0 : i32
    %c0_i32_0 = arith.constant 0 : i32
    return %arg0, %c0_i32 : i32, i32
  }
  func.func @transform_6(%arg0: i32, %arg1: i32) -> (i32, i32) {
    %c0_i32 = arith.constant 0 : i32
    %c0_i32_0 = arith.constant 0 : i32
    return %arg0, %c0_i32 : i32, i32
  }
}

module attributes {stable_mosaic.version = 11 : i64} {
  func.func @_sage_conv_kernel(%arg0: i32, %arg1: i32, %arg2: memref<256x256xi8, #tpu.memory_space<vmem>>, %arg3: memref<256x128xbf16, #tpu.memory_space<vmem>>, %arg4: memref<256x128xbf16, #tpu.memory_space<vmem>>, %arg5: memref<128x128xbf16, #tpu.memory_space<vmem>>, %arg6: memref<1x128xf32, #tpu.memory_space<vmem>>, %arg7: memref<256x1xf32, #tpu.memory_space<vmem>>, %arg8: memref<256x128xf32, #tpu.memory_space<vmem>>, %arg9: memref<256x128xf32, #tpu.memory_space<vmem>>) attributes {dimension_semantics = [#tpu.dimension_semantics<parallel>, #tpu.dimension_semantics<arbitrary>], iteration_bounds = array<i64: 1, 1>, scalar_prefetch = 0 : i64, scratch_operands = 1 : i64, tpu.core_type = #tpu.core_type<tc>, window_params = [{transform_indices = @transform_0, window_bounds = array<i64: 256, 256>}, {transform_indices = @transform_1, window_bounds = array<i64: 256, 128>}, {transform_indices = @transform_2, window_bounds = array<i64: 256, 128>}, {pipeline_mode = #tpu.pipeline_mode<synchronous>, transform_indices = @transform_3, window_bounds = array<i64: 128, 128>}, {pipeline_mode = #tpu.pipeline_mode<synchronous>, transform_indices = @transform_4, window_bounds = array<i64: 1, 128>}, {transform_indices = @transform_5, window_bounds = array<i64: 256, 1>}, {transform_indices = @transform_6, window_bounds = array<i64: 256, 128>}]} {
    %c0_i32 = arith.constant 0 : i32
    %0 = arith.cmpi eq, %arg1, %c0_i32 : i32
    %1 = arith.extui %0 : i1 to i32
    %c0_i32_0 = arith.constant 0 : i32
    %2 = arith.cmpi ne, %1, %c0_i32_0 : i32
    scf.if %2 {
      %cst_10 = arith.constant 0.000000e+00 : f32
      %14 = vector.broadcast %cst_10 : f32 to vector<256x128xf32>
      %c0_11 = arith.constant 0 : index
      %c0_12 = arith.constant 0 : index
      %15 = vector.load %arg9[%c0_11, %c0_12] : memref<256x128xf32, #tpu.memory_space<vmem>>, vector<256x128xf32>
      tpu.vector_store %arg9[%c0_11, %c0_12], %14 {strides = array<i32>} : memref<256x128xf32, #tpu.memory_space<vmem>>, vector<256x128xf32>,
    } else {
    }
    %c0 = arith.constant 0 : index
    %c0_1 = arith.constant 0 : index
    %3 = vector.load %arg2[%c0, %c0_1] : memref<256x256xi8, #tpu.memory_space<vmem>>, vector<256x256xi8>
    %4 = arith.sitofp %3 : vector<256x256xi8> to vector<256x256xf32>
    %5 = arith.truncf %4 : vector<256x256xf32> to vector<256x256xbf16>
    %c0_2 = arith.constant 0 : index
    %c0_3 = arith.constant 0 : index
    %6 = vector.load %arg9[%c0_2, %c0_3] : memref<256x128xf32, #tpu.memory_space<vmem>>, vector<256x128xf32>
    %c0_4 = arith.constant 0 : index
    %c0_5 = arith.constant 0 : index
    %7 = vector.load %arg3[%c0_4, %c0_5] : memref<256x128xbf16, #tpu.memory_space<vmem>>, vector<256x128xbf16>
    %cst = arith.constant dense<0.000000e+00> : vector<256x128xf32>
    %8 = tpu.matmul %5, %7, %cst {dimension_numbers = #tpu.dot_dimension_numbers<[1], [0], [0], [1], [0, 0, 1, 1], [], []>} : vector<256x256xbf16>, vector<256x128xbf16>, vector<256x128xf32> -> vector<256x128xf32>
    %9 = arith.addf %6, %8 : vector<256x128xf32>
    %c0_6 = arith.constant 0 : index
    %c0_7 = arith.constant 0 : index
    %10 = vector.load %arg9[%c0_6, %c0_7] : memref<256x128xf32, #tpu.memory_space<vmem>>, vector<256x128xf32>
    tpu.vector_store %arg9[%c0_6, %c0_7], %9 {strides = array<i32>} : memref<256x128xf32, #tpu.memory_space<vmem>>, vector<256x128xf32>,
    %c0_i32_8 = arith.constant 0 : i32
    %11 = arith.cmpi eq, %arg1, %c0_i32_8 : i32
    %12 = arith.extui %11 : i1 to i32
    %c0_i32_9 = arith.constant 0 : i32
    %13 = arith.cmpi ne, %12, %c0_i32_9 : i32
    scf.if %13 {
      %c0_10 = arith.constant 0 : index
      %c0_11 = arith.constant 0 : index
      %14 = vector.load %arg9[%c0_10, %c0_11] : memref<256x128xf32, #tpu.memory_space<vmem>>, vector<256x128xf32>
      %c0_12 = arith.constant 0 : index
      %c0_13 = arith.constant 0 : index
      %15 = vector.load %arg7[%c0_12, %c0_13] : memref<256x1xf32, #tpu.memory_space<vmem>>, vector<256x1xf32>
      %16 = vector.broadcast %15 : vector<256x1xf32> to vector<256x128xf32>
      %17 = arith.mulf %14, %16 : vector<256x128xf32>
      %c0_14 = arith.constant 0 : index
      %c0_15 = arith.constant 0 : index
      %18 = vector.load %arg4[%c0_14, %c0_15] : memref<256x128xbf16, #tpu.memory_space<vmem>>, vector<256x128xbf16>
      %c0_16 = arith.constant 0 : index
      %c0_17 = arith.constant 0 : index
      %19 = vector.load %arg5[%c0_16, %c0_17] : memref<128x128xbf16, #tpu.memory_space<vmem>>, vector<128x128xbf16>
      %cst_18 = arith.constant dense<0.000000e+00> : vector<256x128xf32>
      %20 = tpu.matmul %18, %19, %cst_18 {dimension_numbers = #tpu.dot_dimension_numbers<[1], [0], [0], [1], [0, 0, 1, 1], [], []>} : vector<256x128xbf16>, vector<128x128xbf16>, vector<256x128xf32> -> vector<256x128xf32>
      %21 = arith.addf %17, %20 : vector<256x128xf32>
      %c0_19 = arith.constant 0 : index
      %c0_20 = arith.constant 0 : index
      %22 = vector.load %arg6[%c0_19, %c0_20] : memref<1x128xf32, #tpu.memory_space<vmem>>, vector<1x128xf32>
      %23 = vector.broadcast %22 : vector<1x128xf32> to vector<256x128xf32>
      %24 = arith.addf %21, %23 : vector<256x128xf32>
      %cst_21 = arith.constant dense<0xFF800000> : vector<256xf32>
      %25 = vector.multi_reduction <maximumf>, %24, %cst_21 [1] : vector<256x128xf32> to vector<256xf32>
      %26 = vector.shape_cast %25 : vector<256xf32> to vector<256x1xf32>
      %27 = vector.broadcast %26 : vector<256x1xf32> to vector<256x128xf32>
      %28 = arith.subf %24, %27 : vector<256x128xf32>
      %29 = math.exp %28 : vector<256x128xf32>
      %cst_22 = arith.constant dense<0.000000e+00> : vector<256xf32>
      %30 = vector.multi_reduction <add>, %29, %cst_22 [1] : vector<256x128xf32> to vector<256xf32>
      %31 = vector.shape_cast %30 : vector<256xf32> to vector<256x1xf32>
      %32 = math.log %31 : vector<256x1xf32>
      %33 = vector.broadcast %32 : vector<256x1xf32> to vector<256x128xf32>
      %34 = arith.subf %28, %33 : vector<256x128xf32>
      %c0_23 = arith.constant 0 : index
      %c0_24 = arith.constant 0 : index
      %35 = vector.load %arg8[%c0_23, %c0_24] : memref<256x128xf32, #tpu.memory_space<vmem>>, vector<256x128xf32>
      tpu.vector_store %arg8[%c0_23, %c0_24], %34 {strides = array<i32>} : memref<256x128xf32, #tpu.memory_space<vmem>>, vector<256x128xf32>,
    } else {
    }
    return
  }
  func.func @transform_0(%arg0: i32, %arg1: i32) -> (i32, i32) {
    %c0_i32 = arith.constant 0 : i32
    return %arg0, %arg1 : i32, i32
  }
  func.func @transform_1(%arg0: i32, %arg1: i32) -> (i32, i32) {
    %c0_i32 = arith.constant 0 : i32
    %c0_i32_0 = arith.constant 0 : i32
    return %arg1, %c0_i32 : i32, i32
  }
  func.func @transform_2(%arg0: i32, %arg1: i32) -> (i32, i32) {
    %c0_i32 = arith.constant 0 : i32
    %c0_i32_0 = arith.constant 0 : i32
    return %arg0, %c0_i32 : i32, i32
  }
  func.func @transform_3(%arg0: i32, %arg1: i32) -> (i32, i32) {
    %c0_i32 = arith.constant 0 : i32
    %c0_i32_0 = arith.constant 0 : i32
    %c0_i32_1 = arith.constant 0 : i32
    return %c0_i32, %c0_i32_0 : i32, i32
  }
  func.func @transform_4(%arg0: i32, %arg1: i32) -> (i32, i32) {
    %c0_i32 = arith.constant 0 : i32
    %c0_i32_0 = arith.constant 0 : i32
    %c0_i32_1 = arith.constant 0 : i32
    return %c0_i32, %c0_i32_0 : i32, i32
  }
  func.func @transform_5(%arg0: i32, %arg1: i32) -> (i32, i32) {
    %c0_i32 = arith.constant 0 : i32
    %c0_i32_0 = arith.constant 0 : i32
    return %arg0, %c0_i32 : i32, i32
  }
  func.func @transform_6(%arg0: i32, %arg1: i32) -> (i32, i32) {
    %c0_i32 = arith.constant 0 : i32
    %c0_i32_0 = arith.constant 0 : i32
    return %arg0, %c0_i32 : i32, i32
  }
}

</mosaic_0001>

<bundles_post_ra>
// kernel: sage_forward.2
= control target key start
LH: loop header
LB: loop body
LE: loop exit
PB: predicated region body
PF: predicated region fallthrough
CT: control target
= control target key end

     0   :  { %v1815_v1 = vmov 0   ;;  %s2308_s1 = inlined_call_operand.vmem [shape: bf16[256,128], index: 1, kind: input, shape index: {}]   ;;  %s2309_s0 = inlined_call_operand.vmem [shape: s8[256,256], index: 0, kind: input, shape index: {}]   ;;  %s2310_s3 = inlined_call_operand.vmem [shape: bf16[128,128], index: 3, kind: input, shape index: {}]   ;;  %s2311_s2 = inlined_call_operand.vmem [shape: bf16[256,128], index: 2, kind: input, shape index: {}]   ;;  %s2312_s5 = inlined_call_operand.vmem [shape: f32[256,1], index: 5, kind: input, shape index: {}]   ;;  %s2313_s4 = inlined_call_operand.vmem [shape: f32[1,128], index: 4, kind: input, shape index: {}]   ;;  %s2314_s6 = inlined_call_operand.vmem [shape: bf16[256,128], index: 6, kind: output, shape index: {}]  }
   0x1   :  { %v1775_v0 = vld [vmem:[%s2308_s1 + $0x40] sm:$0xff]   ;;  %1774 = vset.pattern.permute.xlu1 %v1815_v1  ;;  %1773 = vset.pattern.permute.xlu0 %v1815_v1  ;;  %v1777_v3 = vld [vmem:[%s2308_s1 + $0x48] sm:$0xff]   ;;  %v1779_v5 = vld [vmem:[%s2308_s1 + $0x50] sm:$0xff]  }
   0x2   :  { %v1776_v2 = vld [vmem:[%s2308_s1] sm:$0xff]   ;;  %1572 = vmatprep.subr.bf16.mxu0 %v1775_v0  ;;  %1756 = vmatprep.subr.bf16.mxu1 %v1775_v0  ;;  %v1778_v4 = vld [vmem:[%s2308_s1 + $0x8] sm:$0xff]   ;;  %v1780_v6 = vld [vmem:[%s2308_s1 + $0x10] sm:$0xff]  }
   0x3   :  { %1573 = vmatpush3.bf16.msra.mxu0 %v1776_v2  ;;  %1764 = vmatpush3.bf16.msra.mxu1 %v1776_v2  ;;  %v1781_v7 = vld [vmem:[%s2308_s1 + $0x58] sm:$0xff]   ;;  %v1783_v9 = vld [vmem:[%s2308_s1 + $0x60] sm:$0xff]   ;;  %v1785_v11 = vld [vmem:[%s2308_s1 + $0x68] sm:$0xff]  }
   0x4   :  { %1574 = vmatprep.subr.bf16.mxu0 %v1777_v3  ;;  %1757 = vmatprep.subr.bf16.mxu1 %v1777_v3  ;;  %v1782_v8 = vld [vmem:[%s2308_s1 + $0x18] sm:$0xff]   ;;  %v1784_v10 = vld [vmem:[%s2308_s1 + $0x20] sm:$0xff]   ;;  %v61_v12 = vld [vmem:[%s2309_s0 + $0x8] sm:$0xff] }
   0x5   :  { %v73_v13 = vld [vmem:[%s2309_s0 + $0x68] sm:$0xff]  ;;  %v77_v14 = vunpack.c.l.s8.bf16 %v61_v12  ;;  %v1787_v17 = vld [vmem:[%s2308_s1 + $0x70] sm:$0xff]   ;;  %v1789_v19 = vld [vmem:[%s2308_s1 + $0x78] sm:$0xff]   ;;  %v79_v26 = vunpack.c.h.s8.bf16 %v61_v12 }
   0x6   :  { %v101_v15 = vunpack.c.l.s8.bf16 %v73_v13  ;;  %v1786_v16 = vld [vmem:[%s2308_s1 + $0x28] sm:$0xff]   ;;  %v1788_v18 = vld [vmem:[%s2308_s1 + $0x30] sm:$0xff]   ;;  %v1790_v20 = vld [vmem:[%s2308_s1 + $0x38] sm:$0xff]   ;;  %v103_v29 = vunpack.c.h.s8.bf16 %v73_v13 }
   0x7   :  { %1575 = vmatpush3.bf16.msra.mxu0 %v1778_v4  ;;  %1765 = vmatpush3.bf16.msra.mxu1 %v1778_v4  ;;  %v60_v21 = vld [vmem:[%s2309_s0] sm:$0xff]  ;;  %v530_v27 = vld [vmem:[%s2312_s5 + $0x10] sm:$0xff]  ;;  %v1792_v30 = vld [vmem:[%s2310_s3 + $0x8] sm:$0xff]  }
   0x8   :  { %1576 = vmatprep.subr.bf16.mxu0 %v1779_v5  ;;  %1758 = vmatprep.subr.bf16.mxu1 %v1779_v5  ;;  %v72_v22 = vld [vmem:[%s2309_s0 + $0x60] sm:$0xff]  ;;  %v76_v24 = vunpack.c.l.s8.bf16 %v60_v21  ;;  %v531_v31 = vld [vmem:[%s2312_s5 + $0x18] sm:$0xff]  ;;  %v529_v32 = vld [vmem:[%s2312_s5 + $0x8] sm:$0xff]  ;;  %v78_v36 = vunpack.c.h.s8.bf16 %v60_v21 }
   0x9   :  { %300 = vmatprep.mubr.bf16.mxu0 %v77_v14  ;;  %396 = vmatprep.mubr.bf16.mxu1 %v101_v15  ;;  %v1791_v23 = vld [vmem:[%s2310_s3] sm:$0xff]   ;;  %v100_v25 = vunpack.c.l.s8.bf16 %v72_v22  ;;  %v1793_v33 = vld [vmem:[%s2310_s3 + $0x10] sm:$0xff]   ;;  %v63_v34 = vld [vmem:[%s2309_s0 + $0x18] sm:$0xff]  ;;  %v102_v37 = vunpack.c.h.s8.bf16 %v72_v22 }
   0xa   :  { %v528_v28 = vld [vmem:[%s2312_s5] sm:$0xff]  ;;  %572 = vperm.xlu1 %1774, %v530_v27   ;;  %v75_v35 = vld [vmem:[%s2309_s0 + $0x78] sm:$0xff]  ;;  %v533_v38 = vld [vmem:[%s2312_s5 + $0x28] sm:$0xff]  ;;  %v81_v40 = vunpack.c.l.s8.bf16 %v63_v34  ;;  %v83_v52 = vunpack.c.h.s8.bf16 %v63_v34 }
   0xb   :  { %1577 = vmatpush3.bf16.msra.mxu0 %v1780_v6  ;;  %1766 = vmatpush3.bf16.msra.mxu1 %v1780_v6  ;;  %v532_v39 = vld [vmem:[%s2312_s5 + $0x20] sm:$0xff]  ;;  %v1794_v41 = vld [vmem:[%s2310_s3 + $0x18] sm:$0xff]   ;;  %v105_v42 = vunpack.c.l.s8.bf16 %v75_v35  ;;  %v534_v44 = vld [vmem:[%s2312_s5 + $0x30] sm:$0xff]  ;;  %v107_v54 = vunpack.c.h.s8.bf16 %v75_v35 }
   0xc   :  { %1578 = vmatprep.subr.bf16.mxu0 %v1781_v7  ;;  %1759 = vmatprep.subr.bf16.mxu1 %v1781_v7  ;;  %v535_v43 = vld [vmem:[%s2312_s5 + $0x38] sm:$0xff]  ;;  %v62_v45 = vld [vmem:[%s2309_s0 + $0x10] sm:$0xff]  ;;  %v1795_v47 = vld [vmem:[%s2310_s3 + $0x20] sm:$0xff]  }
   0xd   :  { %562 = vperm.xlu0 %1773, %v528_v28   ;;  %v74_v46 = vld [vmem:[%s2309_s0 + $0x70] sm:$0xff]  ;;  %v80_v48 = vunpack.c.l.s8.bf16 %v62_v45  ;;  %v537_v50 = vld [vmem:[%s2312_s5 + $0x48] sm:$0xff]  ;;  %v536_v51 = vld [vmem:[%s2312_s5 + $0x40] sm:$0xff]  ;;  %v82_v59 = vunpack.c.h.s8.bf16 %v62_v45 }
   0xe   :  { %577 = vperm.xlu1 %1774, %v531_v31   ;;  %v104_v49 = vunpack.c.l.s8.bf16 %v74_v46  ;;  %v1796_v53 = vld [vmem:[%s2310_s3 + $0x28] sm:$0xff]   ;;  %v539_v55 = vld [vmem:[%s2312_s5 + $0x58] sm:$0xff]  ;;  %v538_v56 = vld [vmem:[%s2312_s5 + $0x50] sm:$0xff]  ;;  %v106_v60 = vunpack.c.h.s8.bf16 %v74_v46 }
   0xf   :  { %1579 = vmatpush3.bf16.msra.mxu0 %v1782_v8  ;;  %1767 = vmatpush3.bf16.msra.mxu1 %v1782_v8  ;;  %v1797_v57 = vld [vmem:[%s2310_s3 + $0x30] sm:$0xff]   ;;  %v65_v58 = vld [vmem:[%s2309_s0 + $0x28] sm:$0xff]  ;;  %v540_v62 = vld [vmem:[%s2312_s5 + $0x60] sm:$0xff] }
  0x10   :  { %1580 = vmatprep.subr.bf16.mxu0 %v1783_v9  ;;  %1760 = vmatprep.subr.bf16.mxu1 %v1783_v9  ;;  %v541_v61 = vld [vmem:[%s2312_s5 + $0x68] sm:$0xff]  ;;  %v85_v63 = vunpack.c.l.s8.bf16 %v65_v58  ;;  %v1798_v0 = vld [vmem:[%s2310_s3 + $0x38] sm:$0xff]   ;;  %v1799_v1 = vld [vmem:[%s2311_s2] sm:$0xff]   ;;  %v87_v9 = vunpack.c.h.s8.bf16 %v65_v58 }
  0x11   :  { %567 = vperm.xlu0 %1773, %v529_v32   ;;  %v543_v2 = vld [vmem:[%s2312_s5 + $0x78] sm:$0xff]  ;;  %v542_v3 = vld [vmem:[%s2312_s5 + $0x70] sm:$0xff]  ;;  %v64_v4 = vld [vmem:[%s2309_s0 + $0x20] sm:$0xff] }
  0x12   :  { %587 = vperm.xlu1 %1774, %v533_v38   ;;  %v84_v5 = vunpack.c.l.s8.bf16 %v64_v4  ;;  %v1800_v6 = vld [vmem:[%s2311_s2 + $0x8] sm:$0xff]   ;;  %v544_v8 = vld [vmem:[%s2312_s5 + $0x80] sm:$0xff]  ;;  %v546_v12 = vld [vmem:[%s2312_s5 + $0x90] sm:$0xff]  ;;  %v86_v14 = vunpack.c.h.s8.bf16 %v64_v4 }
  0x13   :  { %1581 = vmatpush3.bf16.msra.mxu0 %v1784_v10  ;;  %1768 = vmatpush3.bf16.msra.mxu1 %v1784_v10  ;;  %v545_v7 = vld [vmem:[%s2312_s5 + $0x88] sm:$0xff]  ;;  %v1801_v10 = vld [vmem:[%s2311_s2 + $0x10] sm:$0xff]   ;;  %v67_v13 = vld [vmem:[%s2309_s0 + $0x38] sm:$0xff] }
  0x14   :  { %1582 = vmatprep.subr.bf16.mxu0 %v1785_v11  ;;  %1761 = vmatprep.subr.bf16.mxu1 %v1785_v11  ;;  %v547_v11 = vld [vmem:[%s2312_s5 + $0x98] sm:$0xff]  ;;  %v550_v21 = vld [vmem:[%s2312_s5 + $0xb0] sm:$0xff]  ;;  %v91_v27 = vunpack.c.h.s8.bf16 %v67_v13  ;;  %v69_v31 = vld [vmem:[%s2309_s0 + $0x48] sm:$0xff] }
  0x15   :  { %582 = vperm.xlu0 %1773, %v532_v39   ;;  %v1802_v15 = vld [vmem:[%s2311_s2 + $0x18] sm:$0xff]   ;;  %v66_v22 = vld [vmem:[%s2309_s0 + $0x30] sm:$0xff]  ;;  %v557_v34 = vld [vmem:[%s2312_s5 + $0xe8] sm:$0xff] }
  0x16   :  { %597 = vperm.xlu1 %1774, %v535_v43   ;;  %v1805_v28 = vld [vmem:[%s2311_s2 + $0x30] sm:$0xff]   ;;  %v90_v32 = vunpack.c.h.s8.bf16 %v66_v22  ;;  %v556_v35 = vld [vmem:[%s2312_s5 + $0xe0] sm:$0xff]  ;;  %v559_v38 = vld [vmem:[%s2312_s5 + $0xf8] sm:$0xff]  ;;  %v95_v43 = vunpack.c.h.s8.bf16 %v69_v31 }
  0x17   :  { %1583 = vmatpush3.bf16.msra.mxu0 %v1786_v16  ;;  %1769 = vmatpush3.bf16.msra.mxu1 %v1786_v16  ;;  %v549_v16 = vld [vmem:[%s2312_s5 + $0xa8] sm:$0xff]  ;;  %v558_v39 = vld [vmem:[%s2312_s5 + $0xf0] sm:$0xff]  ;;  %v71_v45 = vld [vmem:[%s2309_s0 + $0x58] sm:$0xff] }
  0x18   :  { %1584 = vmatprep.subr.bf16.mxu0 %v1787_v17  ;;  %1762 = vmatprep.subr.bf16.mxu1 %v1787_v17  ;;  %v548_v17 = vld [vmem:[%s2312_s5 + $0xa0] sm:$0xff] }
  0x19   :  { %592 = vperm.xlu0 %1773, %v534_v44   ;;  %v1809_v44 = vld [vmem:[%s2311_s2 + $0x50] sm:$0xff]  }
  0x1a   :  { %607 = vperm.xlu1 %1774, %v537_v50   ;;  %v70_v50 = vld [vmem:[%s2309_s0 + $0x50] sm:$0xff] }
  0x1b   :  { %1585 = vmatpush3.bf16.msra.mxu0 %v1788_v18  ;;  %1770 = vmatpush3.bf16.msra.mxu1 %v1788_v18  ;;  %v89_v18 = vunpack.c.l.s8.bf16 %v67_v13 }
  0x1c   :  { %1586 = vmatprep.subr.bf16.mxu0 %v1789_v19  ;;  %1763 = vmatprep.subr.bf16.mxu1 %v1789_v19  ;;  %v1803_v19 = vld [vmem:[%s2311_s2 + $0x20] sm:$0xff]  }
  0x1d   :  { %602 = vperm.xlu0 %1773, %v536_v51   ;;  %v96_v51 = vunpack.c.l.s8.bf16 %v70_v50 }
  0x1e   :  { %617 = vperm.xlu1 %1774, %v539_v55   ;;  %v98_v55 = vunpack.c.h.s8.bf16 %v70_v50 }
  0x1f   :  { %1587 = vmatpush3.bf16.msra.mxu0 %v1790_v20  ;;  %1771 = vmatpush3.bf16.msra.mxu1 %v1790_v20  ;;  %v551_v20 = vld [vmem:[%s2312_s5 + $0xb8] sm:$0xff] }
  0x20   :  { %1708 = vmatprep.subr.bf16.mxu1 %v1791_v23 }
  0x21   :  { %612 = vperm.xlu0 %1773, %v538_v56   ;;  %v1814_v56 = vld [vmem:[%s2311_s2 + $0x78] sm:$0xff]  }
  0x22   :  { %301 = vmatmul.mubr.bf16.vlgmr.msra.gmra.mrb[0].mxu0 %v76_v24  ;;  %397 = vmatmul.mubr.bf16.vlgmr.msra.gmra.mrb[0].mxu1 %v100_v25  ;;  %v1804_v24 = vld [vmem:[%s2311_s2 + $0x28] sm:$0xff]  }
  0x23   :  { %1709 = vmatpush3.bf16.msra.mxu1 %v1791_v23  ;;  %308 = vmatprep.mubr.bf16.mxu0 %v79_v26  ;;  %v88_v23 = vunpack.c.l.s8.bf16 %v66_v22  ;;  %v553_v25 = vld [vmem:[%s2312_s5 + $0xc8] sm:$0xff]  ;;  %v552_v26 = vld [vmem:[%s2312_s5 + $0xc0] sm:$0xff] }
  0x24   :  { %1710 = vmatprep.subr.bf16.mxu1 %v1792_v30  ;;  %404 = vmatprep.mubr.bf16.mxu1 %v103_v29  ;;  %v555_v29 = vld [vmem:[%s2312_s5 + $0xd8] sm:$0xff] }
  0x25   :  { %627 = vperm.xlu1 %1774, %v541_v61   ;;  %622 = vperm.xlu0 %1773, %v540_v62  }
  0x27   :  { %1711 = vmatpush3.bf16.msra.mxu1 %v1792_v30  ;;  %v554_v30 = vld [vmem:[%s2312_s5 + $0xd0] sm:$0xff] }
  0x28   :  { %1712 = vmatprep.subr.bf16.mxu1 %v1793_v33 }
  0x29   :  { %637 = vperm.xlu1 %1774, %v543_v2   ;;  %632 = vperm.xlu0 %1773, %v542_v3  }
  0x2a   :  { %309 = vmatmul.mubr.bf16.gmra.mrb[4].mxu0 %v78_v36  ;;  %405 = vmatmul.mubr.bf16.gmra.mrb[4].mxu1 %v102_v37  ;;  %v93_v36 = vunpack.c.l.s8.bf16 %v69_v31  ;;  %v1807_v37 = vld [vmem:[%s2311_s2 + $0x40] sm:$0xff]  }
  0x2b   :  { %1713 = vmatpush3.bf16.msra.mxu1 %v1793_v33  ;;  %316 = vmatprep.mubr.bf16.mxu0 %v81_v40  ;;  %v1806_v33 = vld [vmem:[%s2311_s2 + $0x38] sm:$0xff]   ;;  %v68_v40 = vld [vmem:[%s2309_s0 + $0x40] sm:$0xff] }
  0x2c   :  { %1714 = vmatprep.subr.bf16.mxu1 %v1794_v41  ;;  %412 = vmatprep.mubr.bf16.mxu1 %v105_v42  ;;  %v1808_v42 = vld [vmem:[%s2311_s2 + $0x48] sm:$0xff]   ;;  %v94_v46 = vunpack.c.h.s8.bf16 %v68_v40 }
  0x2d   :  { %647 = vperm.xlu1 %1774, %v545_v7   ;;  %642 = vperm.xlu0 %1773, %v544_v8  }
  0x2f   :  { %1715 = vmatpush3.bf16.msra.mxu1 %v1794_v41  ;;  %v92_v41 = vunpack.c.l.s8.bf16 %v68_v40 }
  0x30   :  { %1716 = vmatprep.subr.bf16.mxu1 %v1795_v47 }
  0x31   :  { %657 = vperm.xlu1 %1774, %v547_v11   ;;  %652 = vperm.xlu0 %1773, %v546_v12  }
  0x32   :  { %317 = vmatmul.mubr.bf16.gmra.mrb[8].mxu0 %v80_v48  ;;  %413 = vmatmul.mubr.bf16.gmra.mrb[8].mxu1 %v104_v49  ;;  %v97_v48 = vunpack.c.l.s8.bf16 %v71_v45  ;;  %v1811_v49 = vld [vmem:[%s2311_s2 + $0x60] sm:$0xff]  }
  0x33   :  { %1717 = vmatpush3.bf16.msra.mxu1 %v1795_v47  ;;  %324 = vmatprep.mubr.bf16.mxu0 %v83_v52  ;;  %v1810_v47 = vld [vmem:[%s2311_s2 + $0x58] sm:$0xff]   ;;  %v1812_v52 = vld [vmem:[%s2311_s2 + $0x68] sm:$0xff]  }
  0x34   :  { %1718 = vmatprep.subr.bf16.mxu1 %v1796_v53  ;;  %420 = vmatprep.mubr.bf16.mxu1 %v107_v54  ;;  %v1813_v54 = vld [vmem:[%s2311_s2 + $0x70] sm:$0xff]  }
  0x35   :  { %667 = vperm.xlu1 %1774, %v549_v16   ;;  %662 = vperm.xlu0 %1773, %v548_v17  }
  0x37   :  { %1719 = vmatpush3.bf16.msra.mxu1 %v1796_v53  ;;  %v99_v53 = vunpack.c.h.s8.bf16 %v71_v45 }
  0x38   :  { %1720 = vmatprep.subr.bf16.mxu1 %v1797_v57 }
  0x39   :  { %677 = vperm.xlu1 %1774, %v551_v20   ;;  %672 = vperm.xlu0 %1773, %v550_v21  }
  0x3a   :  { %325 = vmatmul.mubr.bf16.gmra.mrb[12].mxu0 %v82_v59  ;;  %421 = vmatmul.mubr.bf16.gmra.mrb[12].mxu1 %v106_v60 }
  0x3b   :  { %1721 = vmatpush3.bf16.msra.mxu1 %v1797_v57  ;;  %332 = vmatprep.mubr.bf16.mxu0 %v85_v63 }
  0x3c   :  { %1722 = vmatprep.subr.bf16.mxu1 %v1798_v0  ;;  %1724 = vmatprep.mubr.bf16.mxu1 %v1799_v1 }
  0x3d   :  { %687 = vperm.xlu1 %1774, %v553_v25   ;;  %682 = vperm.xlu0 %1773, %v552_v26  }
  0x3f   :  { %1723 = vmatpush3.bf16.msra.mxu1 %v1798_v0 }
  0x41   :  { %697 = vperm.xlu1 %1774, %v555_v29   ;;  %692 = vperm.xlu0 %1773, %v554_v30  }
  0x42   :  { %333 = vmatmul.mubr.bf16.gmra.mrb[16].mxu0 %v84_v5  ;;  %1725 = vmatmul.mubr.bf16.vlgmr.msra.gmra.mrb[16].mxu1 %v1800_v6 }
  0x43   :  { %340 = vmatprep.mubr.bf16.mxu0 %v87_v9  ;;  %1728 = vmatprep.mubr.bf16.mxu1 %v1801_v10 }
  0x45   :  { %707 = vperm.xlu1 %1774, %v557_v34   ;;  %702 = vperm.xlu0 %1773, %v556_v35  }
  0x49   :  { %717 = vperm.xlu1 %1774, %v559_v38   ;;  %712 = vperm.xlu0 %1773, %v558_v39  }
  0x4a   :  { %341 = vmatmul.mubr.bf16.gmra.mrb[20].mxu0 %v86_v14  ;;  %1729 = vmatmul.mubr.bf16.gmra.mrb[20].mxu1 %v1802_v15 }
  0x4b   :  { %348 = vmatprep.mubr.bf16.mxu0 %v89_v18  ;;  %1732 = vmatprep.mubr.bf16.mxu1 %v1803_v19 }
  0x52   :  { %349 = vmatmul.mubr.bf16.gmra.mrb[24].mxu0 %v88_v23  ;;  %1733 = vmatmul.mubr.bf16.gmra.mrb[24].mxu1 %v1804_v24 }
  0x53   :  { %356 = vmatprep.mubr.bf16.mxu0 %v91_v27  ;;  %1736 = vmatprep.mubr.bf16.mxu1 %v1805_v28 }
  0x5a   :  { %357 = vmatmul.mubr.bf16.gmra.mrb[28].mxu0 %v90_v32  ;;  %1737 = vmatmul.mubr.bf16.gmra.mrb[28].mxu1 %v1806_v33 }
  0x5b   :  { %364 = vmatprep.mubr.bf16.mxu0 %v93_v36  ;;  %1740 = vmatprep.mubr.bf16.mxu1 %v1807_v37 }
  0x62   :  { %365 = vmatmul.mubr.bf16.gmra.mrb[32].mxu0 %v92_v41  ;;  %1741 = vmatmul.mubr.bf16.gmra.mrb[32].mxu1 %v1808_v42 }
  0x63   :  { %372 = vmatprep.mubr.bf16.mxu0 %v95_v43  ;;  %1744 = vmatprep.mubr.bf16.mxu1 %v1809_v44 }
  0x6a   :  { %373 = vmatmul.mubr.bf16.gmra.mrb[36].mxu0 %v94_v46  ;;  %1745 = vmatmul.mubr.bf16.gmra.mrb[36].mxu1 %v1810_v47 }
  0x6b   :  { %380 = vmatprep.mubr.bf16.mxu0 %v97_v48  ;;  %1748 = vmatprep.mubr.bf16.mxu1 %v1811_v49 }
  0x72   :  { %381 = vmatmul.mubr.bf16.gmra.mrb[40].mxu0 %v96_v51  ;;  %1749 = vmatmul.mubr.bf16.gmra.mrb[40].mxu1 %v1812_v52 }
  0x73   :  { %388 = vmatprep.mubr.bf16.mxu0 %v99_v53  ;;  %1752 = vmatprep.mubr.bf16.mxu1 %v1813_v54 }
  0x7a   :  { %389 = vmatmul.mubr.bf16.gmra.mrb[44].mxu0 %v98_v55  ;;  %1753 = vmatmul.mubr.bf16.gmra.mrb[44].mxu1 %v1814_v56 }
  0x89   :  { %v2115_v57 = vpop.permute.xlu1 %572 }
  0x8c   :  { %v2117_v58 = vpop.permute.xlu0 %562 }
  0x8d   :  { %v2119_v59 = vpop.permute.xlu1 %577 }
  0x90   :  { %v2121_v60 = vpop.permute.xlu0 %567 }
  0x91   :  { %v2123_v61 = vpop.permute.xlu1 %587 }
  0x94   :  { %v2125_v62 = vpop.permute.xlu0 %582 }
  0x95   :  { %v2127_v63 = vpop.permute.xlu1 %597 }
  0x98   :  { %v2129_v0 = vpop.permute.xlu0 %592 }
  0x99   :  { %v2131_v1 = vpop.permute.xlu1 %607 }
  0x9c   :  { %v2133_v2 = vpop.permute.xlu0 %602 }
  0x9d   :  { %v2139_v15 = vpop.permute.xlu1 %617 }
  0xa0   :  { %v2141_v16 = vpop.permute.xlu0 %612 }
  0xa4   :  { %v2147_v29 = vpop.permute.xlu1 %627  ;;  %v2149_v30 = vpop.permute.xlu0 %622 }
  0xa8   :  { %v2157_v43 = vpop.permute.xlu1 %637  ;;  %v2159_v44 = vpop.permute.xlu0 %632 }
  0xf5   :  { %v1588_v3 = vpop.f32.mrb[0].mxu0  ;;  %v1660_v4 = vpop.f32.mrb[0].mxu1 }
  0xf6   :  { %v1589_v5 = vpop.f32.mrb[1].mxu0  ;;  %v1661_v6 = vpop.f32.mrb[1].mxu1 }
  0xf7   :  { %v1590_v7 = vadd.f32 %v1589_v5, %v1588_v3  ;;  %v1591_v8 = vpop.f32.mrb[2].mxu0  ;;  %v2135_v9 = vadd.f32 %v1661_v6, %v1660_v4  ;;  %v1663_v10 = vpop.f32.mrb[2].mxu1 }
  0xf8   :  { %v1592_v11 = vpop.f32.mrb[3].mxu0  ;;  %v1664_v12 = vpop.f32.mrb[3].mxu1 }
  0xf9   :  { %v1593_v13 = vadd.f32 %v1592_v11, %v1591_v8  ;;  %v2137_v14 = vadd.f32 %v1664_v12, %v1663_v10  ;;  %v2165_v3 = vpop.permute.xlu1 %647  ;;  %v2167_v4 = vpop.permute.xlu0 %642  ;;  %v2173_v10 = vld [vmem:[%s2313_s4] ss:$0 sm:$0xff]  ;;  %v720_v11 = vmul.f32 %v1590_v7, %v2117_v58 }
  0xfd   :  { %v1594_v17 = vpop.f32.mrb[4].mxu0  ;;  %v1666_v18 = vpop.f32.mrb[4].mxu1 }
  0xfe   :  { %v1595_v19 = vpop.f32.mrb[5].mxu0  ;;  %v1667_v20 = vpop.f32.mrb[5].mxu1 }
  0xff   :  { %v1596_v21 = vadd.f32 %v1595_v19, %v1594_v17  ;;  %v1597_v22 = vpop.f32.mrb[6].mxu0  ;;  %v2143_v23 = vadd.f32 %v1667_v20, %v1666_v18  ;;  %v1669_v24 = vpop.f32.mrb[6].mxu1 }
 0x100   :  { %v1598_v25 = vpop.f32.mrb[7].mxu0  ;;  %v1670_v26 = vpop.f32.mrb[7].mxu1 }
 0x101   :  { %v1599_v27 = vadd.f32 %v1598_v25, %v1597_v22  ;;  %v2145_v28 = vadd.f32 %v1670_v26, %v1669_v24  ;;  %v722_v5 = vmul.f32 %v1596_v21, %v2115_v57  ;;  %v721_v57 = vmul.f32 %v1593_v13, %v2121_v60 }
 0x103   :  { %v723_v19 = vmul.f32 %v1599_v27, %v2119_v59  ;;  %v2182_v59 = vpop.permute.xlu1 %657  ;;  %v2184_v27 = vpop.permute.xlu0 %652 }
 0x105   :  { %v1600_v31 = vpop.f32.mrb[8].mxu0  ;;  %v1672_v32 = vpop.f32.mrb[8].mxu1 }
 0x106   :  { %v1601_v33 = vpop.f32.mrb[9].mxu0  ;;  %v1673_v34 = vpop.f32.mrb[9].mxu1 }
 0x107   :  { %v1602_v35 = vadd.f32 %v1601_v33, %v1600_v31  ;;  %v1603_v36 = vpop.f32.mrb[10].mxu0  ;;  %v2151_v37 = vadd.f32 %v1673_v34, %v1672_v32  ;;  %v1675_v38 = vpop.f32.mrb[10].mxu1 }
 0x108   :  { %v1604_v39 = vpop.f32.mrb[11].mxu0  ;;  %v1676_v40 = vpop.f32.mrb[11].mxu1 }
 0x109   :  { %v2153_v41 = vadd.f32 %v1604_v39, %v1603_v36  ;;  %v2155_v42 = vadd.f32 %v1676_v40, %v1675_v38 }
 0x10d   :  { %v1606_v45 = vpop.f32.mrb[12].mxu0  ;;  %v1678_v46 = vpop.f32.mrb[12].mxu1 }
 0x10e   :  { %v1607_v47 = vpop.f32.mrb[13].mxu0  ;;  %v1679_v48 = vpop.f32.mrb[13].mxu1 }
 0x10f   :  { %v1608_v49 = vadd.f32 %v1607_v47, %v1606_v45  ;;  %v1609_v50 = vpop.f32.mrb[14].mxu0  ;;  %v2161_v51 = vadd.f32 %v1679_v48, %v1678_v46  ;;  %v1681_v52 = vpop.f32.mrb[14].mxu1  ;;  %v724_v47 = vmul.f32 %v1602_v35, %v2125_v62 }
 0x110   :  { %v1610_v53 = vpop.f32.mrb[15].mxu0  ;;  %v1682_v54 = vpop.f32.mrb[15].mxu1 }
 0x111   :  { %v1611_v55 = vadd.f32 %v1610_v53, %v1609_v50  ;;  %v2163_v56 = vadd.f32 %v1682_v54, %v1681_v52  ;;  %v726_v60 = vmul.f32 %v1608_v49, %v2129_v0  ;;  %v725_v0 = vmul.f32 %v2153_v41, %v2123_v61  ;;  %v2201_v41 = vpop.permute.xlu1 %667 }
 0x113   :  { %v727_v54 = vmul.f32 %v1611_v55, %v2127_v63 }
 0x115   :  { %v1612_v6 = vpop.f32.mrb[16].mxu0  ;;  %v1726_v8 = vpop.f32.mrb[16].mxu1 }
 0x116   :  { %v1107_v12 = vadd.f32 %v1726_v8, %v722_v5  ;;  %v1613_v17 = vpop.f32.mrb[17].mxu0  ;;  %v978_v18 = vpop.f32.mrb[17].mxu1 }
 0x117   :  { %v1614_v20 = vadd.f32 %v1613_v17, %v1612_v6  ;;  %v1105_v22 = vadd.f32 %v978_v18, %v720_v11  ;;  %v1615_v24 = vpop.f32.mrb[18].mxu0  ;;  %v1727_v25 = vpop.f32.mrb[18].mxu1 }
 0x118   :  { %v1146_v21 = vadd.f32 %v2173_v10, %v1107_v12  ;;  %v1108_v26 = vadd.f32 %v1727_v25, %v723_v19  ;;  %v1616_v31 = vpop.f32.mrb[19].mxu0  ;;  %v981_v32 = vpop.f32.mrb[19].mxu1 }
 0x119   :  { %v1144_v33 = vadd.f32 %v2173_v10, %v1105_v22  ;;  %v1617_v34 = vadd.f32 %v1616_v31, %v1615_v24  ;;  %v1106_v58 = vadd.f32 %v981_v32, %v721_v57  ;;  %v2203_v22 = vpop.permute.xlu0 %662 }
 0x11a   :  { %v1147_v7 = vadd.f32 %v2173_v10, %v1108_v26  ;;  %v1178_v38 = vmax.f32 %v1146_v21, 0.0 }
 0x11b   :  { %v1145_v36 = vadd.f32 %v2173_v10, %v1106_v58  ;;  %v1176_v13 = vmax.f32 %v1144_v33, 0.0  ;;  %v728_v33 = vmul.f32 %v1614_v20, %v2133_v2 }
 0x11c   :  { %v1179_v39 = vmax.f32 %v1147_v7, 0.0 }
 0x11d   :  { %v1177_v40 = vmax.f32 %v1145_v36, 0.0  ;;  %v1618_v45 = vpop.f32.mrb[20].mxu0  ;;  %v1730_v46 = vpop.f32.mrb[20].mxu1 }
 0x11e   :  { %v1485_v48 = vpack.c.bf16 %v1179_v39, %v1178_v38  ;;  %v1111_v50 = vadd.f32 %v1730_v46, %v726_v60  ;;  %v1619_v52 = vpop.f32.mrb[21].mxu0  ;;  %v994_v53 = vpop.f32.mrb[21].mxu1 }
 0x11f   :  { %v1480_v5 = vpack.c.bf16 %v1177_v40, %v1176_v13  ;;  %v1620_v6 = vadd.f32 %v1619_v52, %v1618_v45  ;;  %v1109_v8 = vadd.f32 %v994_v53, %v724_v47  ;;  %v1621_v11 = vpop.f32.mrb[22].mxu0  ;;  %v1731_v12 = vpop.f32.mrb[22].mxu1  ;;  %v729_v47 = vmul.f32 %v1617_v34, %v2131_v1 }
 0x120   :  { %1557 = vst [vmem:[%s2314_s6 + $0x8] sm:$0xff] %v1485_v48   ;;  %v1150_v62 = vadd.f32 %v2173_v10, %v1111_v50  ;;  %v1112_v35 = vadd.f32 %v1731_v12, %v727_v54  ;;  %v1622_v49 = vpop.f32.mrb[23].mxu0  ;;  %v997_v17 = vpop.f32.mrb[23].mxu1 }
 0x121   :  { %1481 = vst [vmem:[%s2314_s6] sm:$0xff] %v1480_v5   ;;  %v1148_v63 = vadd.f32 %v2173_v10, %v1109_v8  ;;  %v1623_v55 = vadd.f32 %v1622_v49, %v1621_v11  ;;  %v1110_v18 = vadd.f32 %v997_v17, %v725_v0  ;;  %v730_v57 = vmul.f32 %v1620_v6, %v2141_v16  ;;  %v2219_v34 = vpop.permute.xlu1 %677  ;;  %v2221_v54 = vpop.permute.xlu0 %672 }
 0x122   :  { %v1151_v19 = vadd.f32 %v2173_v10, %v1112_v35  ;;  %v1182_v24 = vmax.f32 %v1150_v62, 0.0 }
 0x123   :  { %v1149_v61 = vadd.f32 %v2173_v10, %v1110_v18  ;;  %v1180_v21 = vmax.f32 %v1148_v63, 0.0  ;;  %v731_v39 = vmul.f32 %v1623_v55, %v2139_v15 }
 0x124   :  { %v1183_v25 = vmax.f32 %v1151_v19, 0.0 }
 0x125   :  { %v1181_v26 = vmax.f32 %v1149_v61, 0.0  ;;  %v1624_v31 = vpop.f32.mrb[24].mxu0  ;;  %v1734_v32 = vpop.f32.mrb[24].mxu1 }
 0x126   :  { %v1495_v58 = vpack.c.bf16 %v1183_v25, %v1182_v24  ;;  %v1115_v7 = vadd.f32 %v1734_v32, %v730_v57  ;;  %v1625_v36 = vpop.f32.mrb[25].mxu0  ;;  %v1010_v38 = vpop.f32.mrb[25].mxu1 }
 0x127   :  { %v1490_v60 = vpack.c.bf16 %v1181_v26, %v1180_v21  ;;  %v1626_v13 = vadd.f32 %v1625_v36, %v1624_v31  ;;  %v1113_v40 = vadd.f32 %v1010_v38, %v728_v33  ;;  %v1627_v45 = vpop.f32.mrb[26].mxu0  ;;  %v1735_v46 = vpop.f32.mrb[26].mxu1 }
 0x128   :  { %1559 = vst [vmem:[%s2314_s6 + $0x18] sm:$0xff] %v1495_v58   ;;  %v1154_v16 = vadd.f32 %v2173_v10, %v1115_v7  ;;  %v1116_v2 = vadd.f32 %v1735_v46, %v731_v39  ;;  %v1628_v20 = vpop.f32.mrb[27].mxu0  ;;  %v1013_v48 = vpop.f32.mrb[27].mxu1 }
 0x129   :  { %1558 = vst [vmem:[%s2314_s6 + $0x10] sm:$0xff] %v1490_v60   ;;  %v1152_v15 = vadd.f32 %v2173_v10, %v1113_v40  ;;  %v1629_v50 = vadd.f32 %v1628_v20, %v1627_v45  ;;  %v1114_v52 = vadd.f32 %v1013_v48, %v729_v47  ;;  %v732_v62 = vmul.f32 %v1626_v13, %v2149_v30  ;;  %v2235_v58 = vpop.permute.xlu1 %687  ;;  %v683_v7 = vpop.permute.xlu0 %682 }
 0x12a   :  { %v1155_v53 = vadd.f32 %v2173_v10, %v1116_v2  ;;  %v1186_v5 = vmax.f32 %v1154_v16, 0.0 }
 0x12b   :  { %v1153_v1 = vadd.f32 %v2173_v10, %v1114_v52  ;;  %v1184_v8 = vmax.f32 %v1152_v15, 0.0  ;;  %v733_v24 = vmul.f32 %v1629_v50, %v2147_v29 }
 0x12c   :  { %v1187_v6 = vmax.f32 %v1155_v53, 0.0 }
 0x12d   :  { %v1185_v11 = vmax.f32 %v1153_v1, 0.0  ;;  %v1630_v12 = vpop.f32.mrb[28].mxu0  ;;  %v1738_v0 = vpop.f32.mrb[28].mxu1 }
 0x12e   :  { %v1505_v35 = vpack.c.bf16 %v1187_v6, %v1186_v5  ;;  %v1631_v49 = vpop.f32.mrb[29].mxu0  ;;  %v1026_v17 = vpop.f32.mrb[29].mxu1 }
 0x12f   :  { %v1500_v63 = vpack.c.bf16 %v1185_v11, %v1184_v8  ;;  %v1632_v55 = vadd.f32 %v1631_v49, %v1630_v12  ;;  %v1117_v18 = vadd.f32 %v1026_v17, %v732_v62  ;;  %v1633_v19 = vpop.f32.mrb[30].mxu0  ;;  %v1739_v61 = vpop.f32.mrb[30].mxu1 }
 0x130   :  { %1561 = vst [vmem:[%s2314_s6 + $0x28] sm:$0xff] %v1505_v35   ;;  %v1634_v25 = vpop.f32.mrb[31].mxu0  ;;  %v1029_v57 = vpop.f32.mrb[31].mxu1 }
 0x131   :  { %1560 = vst [vmem:[%s2314_s6 + $0x20] sm:$0xff] %v1500_v63   ;;  %v734_v30 = vmul.f32 %v1632_v55, %v2159_v44  ;;  %v1156_v21 = vadd.f32 %v2173_v10, %v1117_v18  ;;  %v1635_v26 = vadd.f32 %v1634_v25, %v1633_v19  ;;  %v1118_v31 = vadd.f32 %v1029_v57, %v733_v24  ;;  %v698_v8 = vpop.permute.xlu1 %697  ;;  %v693_v11 = vpop.permute.xlu0 %692 }
 0x133   :  { %v1119_v32 = vadd.f32 %v1738_v0, %v734_v30  ;;  %v735_v33 = vmul.f32 %v1635_v26, %v2157_v43  ;;  %v1157_v29 = vadd.f32 %v2173_v10, %v1118_v31  ;;  %v1188_v38 = vmax.f32 %v1156_v21, 0.0 }
 0x134   :  { %v746_v31 = vmul.f32 %v2143_v23, %v693_v11 }
 0x135   :  { %v1158_v36 = vadd.f32 %v2173_v10, %v1119_v32  ;;  %v1120_v39 = vadd.f32 %v1739_v61, %v735_v33  ;;  %v1189_v60 = vmax.f32 %v1157_v29, 0.0  ;;  %v1636_v13 = vpop.f32.mrb[32].mxu0  ;;  %v1742_v40 = vpop.f32.mrb[32].mxu1  ;;  %v744_v29 = vmul.f32 %v2135_v9, %v683_v7 }
 0x136   :  { %v1637_v44 = vpop.f32.mrb[33].mxu0  ;;  %v1042_v45 = vpop.f32.mrb[33].mxu1  ;;  %v745_v7 = vmul.f32 %v2137_v14, %v2235_v58 }
 0x137   :  { %v1159_v46 = vadd.f32 %v2173_v10, %v1120_v39  ;;  %v1510_v47 = vpack.c.bf16 %v1189_v60, %v1188_v38  ;;  %v1638_v16 = vadd.f32 %v1637_v44, %v1636_v13  ;;  %v1639_v2 = vpop.f32.mrb[34].mxu0  ;;  %v1743_v43 = vpop.f32.mrb[34].mxu1  ;;  %v1190_v15 = vmax.f32 %v1158_v36, 0.0 }
 0x138   :  { %v1640_v20 = vpop.f32.mrb[35].mxu0  ;;  %v1045_v48 = vpop.f32.mrb[35].mxu1  ;;  %v747_v60 = vmul.f32 %v2145_v28, %v698_v8 }
 0x139   :  { %v1191_v50 = vmax.f32 %v1159_v46, 0.0  ;;  %1562 = vst [vmem:[%s2314_s6 + $0x30] sm:$0xff] %v1510_v47   ;;  %v736_v52 = vmul.f32 %v1638_v16, %v2167_v4  ;;  %v1641_v53 = vadd.f32 %v1640_v20, %v1639_v2  ;;  %v708_v32 = vpop.permute.xlu1 %707  ;;  %v703_v33 = vpop.permute.xlu0 %702 }
 0x13b   :  { %v1515_v1 = vpack.c.bf16 %v1191_v50, %v1190_v15  ;;  %v1121_v5 = vadd.f32 %v1042_v45, %v736_v52  ;;  %v737_v6 = vmul.f32 %v1641_v53, %v2165_v3 }
 0x13d   :  { %1563 = vst [vmem:[%s2314_s6 + $0x38] sm:$0xff] %v1515_v1   ;;  %v1160_v12 = vadd.f32 %v2173_v10, %v1121_v5  ;;  %v1122_v0 = vadd.f32 %v1045_v48, %v737_v6  ;;  %v1642_v62 = vpop.f32.mrb[36].mxu0  ;;  %v2248_v35 = vpop.f32.mrb[36].mxu1 }
 0x13e   :  { %v1643_v49 = vpop.f32.mrb[37].mxu0  ;;  %v1058_v17 = vpop.f32.mrb[37].mxu1 }
 0x13f   :  { %v1161_v4 = vadd.f32 %v2173_v10, %v1122_v0  ;;  %v1644_v63 = vadd.f32 %v1643_v49, %v1642_v62  ;;  %v1645_v55 = vpop.f32.mrb[38].mxu0  ;;  %v2251_v18 = vpop.f32.mrb[38].mxu1  ;;  %v1192_v61 = vmax.f32 %v1160_v12, 0.0  ;;  %v748_v62 = vmul.f32 %v2151_v37, %v703_v33 }
 0x140   :  { %v1646_v3 = vpop.f32.mrb[39].mxu0  ;;  %v1061_v19 = vpop.f32.mrb[39].mxu1 }
 0x141   :  { %v1193_v24 = vmax.f32 %v1161_v4, 0.0  ;;  %v738_v25 = vmul.f32 %v1644_v63, %v2184_v27  ;;  %v1647_v57 = vadd.f32 %v1646_v3, %v1645_v55  ;;  %v713_v20 = vpop.permute.xlu0 %712  ;;  %v718_v52 = vpop.permute.xlu1 %717 }
 0x142   :  { %v750_v58 = vmul.f32 %v2161_v51, %v713_v20 }
 0x143   :  { %v1520_v30 = vpack.c.bf16 %v1193_v24, %v1192_v61  ;;  %v1123_v21 = vadd.f32 %v1742_v40, %v738_v25  ;;  %v739_v26 = vmul.f32 %v1647_v57, %v2182_v59 }
 0x145   :  { %1564 = vst [vmem:[%s2314_s6 + $0x40] sm:$0xff] %v1520_v30   ;;  %v1162_v36 = vadd.f32 %v2173_v10, %v1123_v21  ;;  %v1124_v38 = vadd.f32 %v1743_v43, %v739_v26  ;;  %v1648_v39 = vpop.f32.mrb[40].mxu0  ;;  %v1750_v27 = vpop.f32.mrb[40].mxu1  ;;  %v749_v21 = vmul.f32 %v2155_v42, %v708_v32 }
 0x146   :  { %v1131_v13 = vadd.f32 %v1750_v27, %v746_v31  ;;  %v1649_v40 = vpop.f32.mrb[41].mxu0  ;;  %v1074_v59 = vpop.f32.mrb[41].mxu1 }
 0x147   :  { %v1163_v23 = vadd.f32 %v2173_v10, %v1124_v38  ;;  %v1650_v44 = vadd.f32 %v1649_v40, %v1648_v39  ;;  %v1129_v45 = vadd.f32 %v1074_v59, %v744_v29  ;;  %v1651_v46 = vpop.f32.mrb[42].mxu0  ;;  %v1751_v9 = vpop.f32.mrb[42].mxu1  ;;  %v1194_v48 = vmax.f32 %v1162_v36, 0.0 }
 0x148   :  { %v1170_v47 = vadd.f32 %v2173_v10, %v1131_v13  ;;  %v1132_v16 = vadd.f32 %v1751_v9, %v747_v60  ;;  %v1652_v2 = vpop.f32.mrb[43].mxu0  ;;  %v1077_v43 = vpop.f32.mrb[43].mxu1 }
 0x149   :  { %v1195_v28 = vmax.f32 %v1163_v23, 0.0  ;;  %v740_v15 = vmul.f32 %v1650_v44, %v2203_v22  ;;  %v1653_v50 = vadd.f32 %v1652_v2, %v1651_v46  ;;  %v1168_v53 = vadd.f32 %v2173_v10, %v1129_v45 }
 0x14a   :  { %v1171_v1 = vadd.f32 %v2173_v10, %v1132_v16  ;;  %v1130_v5 = vadd.f32 %v1077_v43, %v745_v7  ;;  %v1202_v11 = vmax.f32 %v1170_v47, 0.0  ;;  %v751_v22 = vmul.f32 %v2163_v56, %v718_v52 }
 0x14b   :  { %v1525_v6 = vpack.c.bf16 %v1195_v28, %v1194_v48  ;;  %v1125_v8 = vadd.f32 %v1058_v17, %v740_v15  ;;  %v741_v14 = vmul.f32 %v1653_v50, %v2201_v41  ;;  %v1200_v41 = vmax.f32 %v1168_v53, 0.0 }
 0x14c   :  { %v1203_v12 = vmax.f32 %v1171_v1, 0.0  ;;  %v1169_v0 = vadd.f32 %v2173_v10, %v1130_v5 }
 0x14d   :  { %1565 = vst [vmem:[%s2314_s6 + $0x48] sm:$0xff] %v1525_v6   ;;  %v1164_v49 = vadd.f32 %v2173_v10, %v1125_v8  ;;  %v1126_v4 = vadd.f32 %v1061_v19, %v741_v14  ;;  %v1654_v17 = vpop.f32.mrb[44].mxu0  ;;  %v1754_v63 = vpop.f32.mrb[44].mxu1 }
 0x14e   :  { %v1545_v55 = vpack.c.bf16 %v1203_v12, %v1202_v11  ;;  %v1201_v51 = vmax.f32 %v1169_v0, 0.0  ;;  %v1135_v3 = vadd.f32 %v1754_v63, %v750_v58  ;;  %v1655_v61 = vpop.f32.mrb[45].mxu0  ;;  %v1090_v24 = vpop.f32.mrb[45].mxu1 }
 0x14f   :  { %v1165_v25 = vadd.f32 %v2173_v10, %v1126_v4  ;;  %v1656_v37 = vadd.f32 %v1655_v61, %v1654_v17  ;;  %v1133_v57 = vadd.f32 %v1090_v24, %v748_v62  ;;  %v1657_v56 = vpop.f32.mrb[46].mxu0  ;;  %v1755_v30 = vpop.f32.mrb[46].mxu1  ;;  %v1196_v36 = vmax.f32 %v1164_v49, 0.0 }
 0x150   :  { %1569 = vst [vmem:[%s2314_s6 + $0x68] sm:$0xff] %v1545_v55   ;;  %v1540_v19 = vpack.c.bf16 %v1201_v51, %v1200_v41  ;;  %v1174_v26 = vadd.f32 %v2173_v10, %v1135_v3  ;;  %v1136_v31 = vadd.f32 %v1755_v30, %v751_v22  ;;  %v1658_v33 = vpop.f32.mrb[47].mxu0  ;;  %v1093_v29 = vpop.f32.mrb[47].mxu1 }
 0x151   :  { %v1197_v38 = vmax.f32 %v1165_v25, 0.0  ;;  %v742_v39 = vmul.f32 %v1656_v37, %v2221_v54  ;;  %v1659_v27 = vadd.f32 %v1658_v33, %v1657_v56  ;;  %v1172_v42 = vadd.f32 %v2173_v10, %v1133_v57 }
 0x152   :  { %1568 = vst [vmem:[%s2314_s6 + $0x60] sm:$0xff] %v1540_v19   ;;  %v1175_v32 = vadd.f32 %v2173_v10, %v1136_v31  ;;  %v1134_v60 = vadd.f32 %v1093_v29, %v749_v21  ;;  %v1206_v23 = vmax.f32 %v1174_v26, 0.0 }
 0x153   :  { %v1530_v13 = vpack.c.bf16 %v1197_v38, %v1196_v36  ;;  %v1127_v40 = vadd.f32 %v2248_v35, %v742_v39  ;;  %v743_v59 = vmul.f32 %v1659_v27, %v2219_v34  ;;  %v1204_v9 = vmax.f32 %v1172_v42, 0.0 }
 0x154   :  { %v1207_v44 = vmax.f32 %v1175_v32, 0.0  ;;  %v1173_v45 = vadd.f32 %v2173_v10, %v1134_v60 }
 0x155   :  { %1566 = vst [vmem:[%s2314_s6 + $0x50] sm:$0xff] %v1530_v13   ;;  %v1166_v54 = vadd.f32 %v2173_v10, %v1127_v40  ;;  %v1128_v46 = vadd.f32 %v2251_v18, %v743_v59 }
 0x156   :  { %v1555_v7 = vpack.c.bf16 %v1207_v44, %v1206_v23  ;;  %v1205_v47 = vmax.f32 %v1173_v45, 0.0 }
 0x157   :  { %v1167_v16 = vadd.f32 %v2173_v10, %v1128_v46  ;;  %v1198_v35 = vmax.f32 %v1166_v54, 0.0 }
 0x158   :  { %1571 = vst [vmem:[%s2314_s6 + $0x78] sm:$0xff] %v1555_v7   ;;  %v1550_v34 = vpack.c.bf16 %v1205_v47, %v1204_v9 }
 0x159   :  { %v1199_v2 = vmax.f32 %v1167_v16, 0.0 }
 0x15a   :  { %1570 = vst [vmem:[%s2314_s6 + $0x70] sm:$0xff] %v1550_v34  }
 0x15b   :  { %v1535_v43 = vpack.c.bf16 %v1199_v2, %v1198_v35 }
 0x15d   :  { %1567 = vst [vmem:[%s2314_s6 + $0x58] sm:$0xff] %v1535_v43  }

// kernel: sage_forward.3
= control target key start
LH: loop header
LB: loop body
LE: loop exit
PB: predicated region body
PF: predicated region fallthrough
CT: control target
= control target key end

     0   :  { %v1944_v1 = vmov 0   ;;  %s2735_s1 = inlined_call_operand.vmem [shape: bf16[256,128], index: 1, kind: input, shape index: {}]   ;;  %s2736_s0 = inlined_call_operand.vmem [shape: s8[256,256], index: 0, kind: input, shape index: {}]   ;;  %s2737_s3 = inlined_call_operand.vmem [shape: bf16[128,128], index: 3, kind: input, shape index: {}]   ;;  %s2738_s2 = inlined_call_operand.vmem [shape: bf16[256,128], index: 2, kind: input, shape index: {}]   ;;  %s2739_s5 = inlined_call_operand.vmem [shape: f32[256,1], index: 5, kind: input, shape index: {}]   ;;  %s2740_s4 = inlined_call_operand.vmem [shape: f32[1,128], index: 4, kind: input, shape index: {}]   ;;  %s2741_s6 = inlined_call_operand.vmem [shape: f32[256,128], index: 6, kind: output, shape index: {}]  }
   0x1   :  { %v1776_v0 = vld [vmem:[%s2735_s1 + $0x40] sm:$0xff]   ;;  %1774 = vset.pattern.permute.xlu0 %v1944_v1  ;;  %1775 = vset.pattern.permute.xlu1 %v1944_v1  ;;  %v1778_v3 = vld [vmem:[%s2735_s1 + $0x48] sm:$0xff]   ;;  %v1780_v5 = vld [vmem:[%s2735_s1 + $0x50] sm:$0xff]  }
   0x2   :  { %v1777_v2 = vld [vmem:[%s2735_s1] sm:$0xff]   ;;  %1573 = vmatprep.subr.bf16.mxu0 %v1776_v0  ;;  %1757 = vmatprep.subr.bf16.mxu1 %v1776_v0  ;;  %v1779_v4 = vld [vmem:[%s2735_s1 + $0x8] sm:$0xff]   ;;  %v1781_v6 = vld [vmem:[%s2735_s1 + $0x10] sm:$0xff]  }
   0x3   :  { %1574 = vmatpush3.bf16.msra.mxu0 %v1777_v2  ;;  %1765 = vmatpush3.bf16.msra.mxu1 %v1777_v2  ;;  %v1782_v7 = vld [vmem:[%s2735_s1 + $0x58] sm:$0xff]   ;;  %v1784_v9 = vld [vmem:[%s2735_s1 + $0x60] sm:$0xff]   ;;  %v1786_v11 = vld [vmem:[%s2735_s1 + $0x68] sm:$0xff]  }
   0x4   :  { %1575 = vmatprep.subr.bf16.mxu0 %v1778_v3  ;;  %1758 = vmatprep.subr.bf16.mxu1 %v1778_v3  ;;  %v1783_v8 = vld [vmem:[%s2735_s1 + $0x18] sm:$0xff]   ;;  %v1785_v10 = vld [vmem:[%s2735_s1 + $0x20] sm:$0xff]   ;;  %v61_v12 = vld [vmem:[%s2736_s0 + $0x8] sm:$0xff] }
   0x5   :  { %v73_v13 = vld [vmem:[%s2736_s0 + $0x68] sm:$0xff]  ;;  %v77_v14 = vunpack.c.l.s8.bf16 %v61_v12  ;;  %v1788_v17 = vld [vmem:[%s2735_s1 + $0x70] sm:$0xff]   ;;  %v1790_v19 = vld [vmem:[%s2735_s1 + $0x78] sm:$0xff]   ;;  %v79_v27 = vunpack.c.h.s8.bf16 %v61_v12 }
   0x6   :  { %v101_v15 = vunpack.c.l.s8.bf16 %v73_v13  ;;  %v1787_v16 = vld [vmem:[%s2735_s1 + $0x28] sm:$0xff]   ;;  %v1789_v18 = vld [vmem:[%s2735_s1 + $0x30] sm:$0xff]   ;;  %v1791_v20 = vld [vmem:[%s2735_s1 + $0x38] sm:$0xff]   ;;  %v103_v29 = vunpack.c.h.s8.bf16 %v73_v13 }
   0x7   :  { %1576 = vmatpush3.bf16.msra.mxu0 %v1779_v4  ;;  %1766 = vmatpush3.bf16.msra.mxu1 %v1779_v4  ;;  %v60_v21 = vld [vmem:[%s2736_s0] sm:$0xff]  ;;  %v530_v28 = vld [vmem:[%s2739_s5 + $0x10] sm:$0xff]  ;;  %v1793_v30 = vld [vmem:[%s2737_s3 + $0x8] sm:$0xff]  }
   0x8   :  { %1577 = vmatprep.subr.bf16.mxu0 %v1780_v5  ;;  %1759 = vmatprep.subr.bf16.mxu1 %v1780_v5  ;;  %v72_v22 = vld [vmem:[%s2736_s0 + $0x60] sm:$0xff]  ;;  %v76_v25 = vunpack.c.l.s8.bf16 %v60_v21  ;;  %v529_v31 = vld [vmem:[%s2739_s5 + $0x8] sm:$0xff]  ;;  %v531_v32 = vld [vmem:[%s2739_s5 + $0x18] sm:$0xff]  ;;  %v78_v37 = vunpack.c.h.s8.bf16 %v60_v21 }
   0x9   :  { %300 = vmatprep.mubr.bf16.mxu0 %v77_v14  ;;  %396 = vmatprep.mubr.bf16.mxu1 %v101_v15  ;;  %v1792_v23 = vld [vmem:[%s2737_s3] sm:$0xff]   ;;  %v100_v26 = vunpack.c.l.s8.bf16 %v72_v22  ;;  %v1794_v33 = vld [vmem:[%s2737_s3 + $0x10] sm:$0xff]   ;;  %v63_v34 = vld [vmem:[%s2736_s0 + $0x18] sm:$0xff]  ;;  %v102_v38 = vunpack.c.h.s8.bf16 %v72_v22 }
   0xa   :  { %v528_v24 = vld [vmem:[%s2739_s5] sm:$0xff]  ;;  %572 = vperm.xlu1 %1775, %v530_v28   ;;  %v75_v35 = vld [vmem:[%s2736_s0 + $0x78] sm:$0xff]  ;;  %v533_v39 = vld [vmem:[%s2739_s5 + $0x28] sm:$0xff]  ;;  %v81_v40 = vunpack.c.l.s8.bf16 %v63_v34  ;;  %v83_v52 = vunpack.c.h.s8.bf16 %v63_v34 }
   0xb   :  { %1578 = vmatpush3.bf16.msra.mxu0 %v1781_v6  ;;  %1767 = vmatpush3.bf16.msra.mxu1 %v1781_v6  ;;  %v532_v36 = vld [vmem:[%s2739_s5 + $0x20] sm:$0xff]  ;;  %v1795_v41 = vld [vmem:[%s2737_s3 + $0x18] sm:$0xff]   ;;  %v105_v42 = vunpack.c.l.s8.bf16 %v75_v35  ;;  %v534_v43 = vld [vmem:[%s2739_s5 + $0x30] sm:$0xff]  ;;  %v107_v54 = vunpack.c.h.s8.bf16 %v75_v35 }
   0xc   :  { %1579 = vmatprep.subr.bf16.mxu0 %v1782_v7  ;;  %1760 = vmatprep.subr.bf16.mxu1 %v1782_v7  ;;  %v535_v44 = vld [vmem:[%s2739_s5 + $0x38] sm:$0xff]  ;;  %v62_v45 = vld [vmem:[%s2736_s0 + $0x10] sm:$0xff]  ;;  %v1796_v47 = vld [vmem:[%s2737_s3 + $0x20] sm:$0xff]  }
   0xd   :  { %562 = vperm.xlu0 %1774, %v528_v24   ;;  %v74_v46 = vld [vmem:[%s2736_s0 + $0x70] sm:$0xff]  ;;  %v80_v48 = vunpack.c.l.s8.bf16 %v62_v45  ;;  %v536_v50 = vld [vmem:[%s2739_s5 + $0x40] sm:$0xff]  ;;  %v537_v51 = vld [vmem:[%s2739_s5 + $0x48] sm:$0xff]  ;;  %v82_v59 = vunpack.c.h.s8.bf16 %v62_v45 }
   0xe   :  { %577 = vperm.xlu1 %1775, %v531_v32   ;;  %v104_v49 = vunpack.c.l.s8.bf16 %v74_v46  ;;  %v1797_v53 = vld [vmem:[%s2737_s3 + $0x28] sm:$0xff]   ;;  %v538_v55 = vld [vmem:[%s2739_s5 + $0x50] sm:$0xff]  ;;  %v539_v56 = vld [vmem:[%s2739_s5 + $0x58] sm:$0xff]  ;;  %v106_v60 = vunpack.c.h.s8.bf16 %v74_v46 }
   0xf   :  { %1580 = vmatpush3.bf16.msra.mxu0 %v1783_v8  ;;  %1768 = vmatpush3.bf16.msra.mxu1 %v1783_v8  ;;  %v1798_v57 = vld [vmem:[%s2737_s3 + $0x30] sm:$0xff]   ;;  %v65_v58 = vld [vmem:[%s2736_s0 + $0x28] sm:$0xff]  ;;  %v540_v61 = vld [vmem:[%s2739_s5 + $0x60] sm:$0xff] }
  0x10   :  { %1581 = vmatprep.subr.bf16.mxu0 %v1784_v9  ;;  %1761 = vmatprep.subr.bf16.mxu1 %v1784_v9  ;;  %v541_v62 = vld [vmem:[%s2739_s5 + $0x68] sm:$0xff]  ;;  %v85_v63 = vunpack.c.l.s8.bf16 %v65_v58  ;;  %v1799_v0 = vld [vmem:[%s2737_s3 + $0x38] sm:$0xff]   ;;  %v1800_v1 = vld [vmem:[%s2738_s2] sm:$0xff]   ;;  %v87_v9 = vunpack.c.h.s8.bf16 %v65_v58 }
  0x11   :  { %567 = vperm.xlu0 %1774, %v529_v31   ;;  %v542_v2 = vld [vmem:[%s2739_s5 + $0x70] sm:$0xff]  ;;  %v543_v3 = vld [vmem:[%s2739_s5 + $0x78] sm:$0xff]  ;;  %v64_v4 = vld [vmem:[%s2736_s0 + $0x20] sm:$0xff] }
  0x12   :  { %587 = vperm.xlu1 %1775, %v533_v39   ;;  %v84_v5 = vunpack.c.l.s8.bf16 %v64_v4  ;;  %v1801_v6 = vld [vmem:[%s2738_s2 + $0x8] sm:$0xff]   ;;  %v544_v7 = vld [vmem:[%s2739_s5 + $0x80] sm:$0xff]  ;;  %v547_v12 = vld [vmem:[%s2739_s5 + $0x98] sm:$0xff]  ;;  %v86_v14 = vunpack.c.h.s8.bf16 %v64_v4 }
  0x13   :  { %1582 = vmatpush3.bf16.msra.mxu0 %v1785_v10  ;;  %1769 = vmatpush3.bf16.msra.mxu1 %v1785_v10  ;;  %v545_v8 = vld [vmem:[%s2739_s5 + $0x88] sm:$0xff]  ;;  %v1802_v10 = vld [vmem:[%s2738_s2 + $0x10] sm:$0xff]   ;;  %v67_v13 = vld [vmem:[%s2736_s0 + $0x38] sm:$0xff] }
  0x14   :  { %1583 = vmatprep.subr.bf16.mxu0 %v1786_v11  ;;  %1762 = vmatprep.subr.bf16.mxu1 %v1786_v11  ;;  %v546_v11 = vld [vmem:[%s2739_s5 + $0x90] sm:$0xff]  ;;  %v1803_v15 = vld [vmem:[%s2738_s2 + $0x18] sm:$0xff]   ;;  %v1805_v24 = vld [vmem:[%s2738_s2 + $0x28] sm:$0xff]  }
  0x15   :  { %582 = vperm.xlu0 %1774, %v532_v36   ;;  %v551_v21 = vld [vmem:[%s2739_s5 + $0xb8] sm:$0xff]  ;;  %v66_v22 = vld [vmem:[%s2736_s0 + $0x30] sm:$0xff]  ;;  %v69_v31 = vld [vmem:[%s2736_s0 + $0x48] sm:$0xff] }
  0x16   :  { %597 = vperm.xlu1 %1775, %v535_v44   ;;  %v1806_v28 = vld [vmem:[%s2738_s2 + $0x30] sm:$0xff]   ;;  %v90_v32 = vunpack.c.h.s8.bf16 %v66_v22  ;;  %v556_v34 = vld [vmem:[%s2739_s5 + $0xe0] sm:$0xff]  ;;  %v557_v35 = vld [vmem:[%s2739_s5 + $0xe8] sm:$0xff]  ;;  %v93_v36 = vunpack.c.l.s8.bf16 %v69_v31 }
  0x17   :  { %1584 = vmatpush3.bf16.msra.mxu0 %v1787_v16  ;;  %1770 = vmatpush3.bf16.msra.mxu1 %v1787_v16  ;;  %v548_v16 = vld [vmem:[%s2739_s5 + $0xa0] sm:$0xff]  ;;  %v559_v39 = vld [vmem:[%s2739_s5 + $0xf8] sm:$0xff]  ;;  %v1810_v44 = vld [vmem:[%s2738_s2 + $0x50] sm:$0xff]  }
  0x18   :  { %1585 = vmatprep.subr.bf16.mxu0 %v1788_v17  ;;  %1763 = vmatprep.subr.bf16.mxu1 %v1788_v17  ;;  %v549_v17 = vld [vmem:[%s2739_s5 + $0xa8] sm:$0xff]  ;;  %v71_v45 = vld [vmem:[%s2736_s0 + $0x58] sm:$0xff] }
  0x19   :  { %592 = vperm.xlu0 %1774, %v534_v43   ;;  %v95_v43 = vunpack.c.h.s8.bf16 %v69_v31 }
  0x1a   :  { %607 = vperm.xlu1 %1775, %v537_v51  }
  0x1b   :  { %1586 = vmatpush3.bf16.msra.mxu0 %v1789_v18  ;;  %1771 = vmatpush3.bf16.msra.mxu1 %v1789_v18  ;;  %v89_v18 = vunpack.c.l.s8.bf16 %v67_v13 }
  0x1c   :  { %1587 = vmatprep.subr.bf16.mxu0 %v1790_v19  ;;  %1764 = vmatprep.subr.bf16.mxu1 %v1790_v19  ;;  %v1804_v19 = vld [vmem:[%s2738_s2 + $0x20] sm:$0xff]  }
  0x1d   :  { %602 = vperm.xlu0 %1774, %v536_v50   ;;  %v70_v50 = vld [vmem:[%s2736_s0 + $0x50] sm:$0xff] }
  0x1e   :  { %617 = vperm.xlu1 %1775, %v539_v56   ;;  %v96_v51 = vunpack.c.l.s8.bf16 %v70_v50  ;;  %v1815_v56 = vld [vmem:[%s2738_s2 + $0x78] sm:$0xff]  }
  0x1f   :  { %1588 = vmatpush3.bf16.msra.mxu0 %v1791_v20  ;;  %1772 = vmatpush3.bf16.msra.mxu1 %v1791_v20  ;;  %v550_v20 = vld [vmem:[%s2739_s5 + $0xb0] sm:$0xff] }
  0x20   :  { %1709 = vmatprep.subr.bf16.mxu1 %v1792_v23 }
  0x21   :  { %612 = vperm.xlu0 %1774, %v538_v55   ;;  %v98_v55 = vunpack.c.h.s8.bf16 %v70_v50 }
  0x22   :  { %301 = vmatmul.mubr.bf16.vlgmr.msra.gmra.mrb[0].mxu0 %v76_v25  ;;  %397 = vmatmul.mubr.bf16.vlgmr.msra.gmra.mrb[0].mxu1 %v100_v26  ;;  %v552_v25 = vld [vmem:[%s2739_s5 + $0xc0] sm:$0xff]  ;;  %v553_v26 = vld [vmem:[%s2739_s5 + $0xc8] sm:$0xff] }
  0x23   :  { %1710 = vmatpush3.bf16.msra.mxu1 %v1792_v23  ;;  %308 = vmatprep.mubr.bf16.mxu0 %v79_v27  ;;  %v88_v23 = vunpack.c.l.s8.bf16 %v66_v22  ;;  %v91_v27 = vunpack.c.h.s8.bf16 %v67_v13 }
  0x24   :  { %1711 = vmatprep.subr.bf16.mxu1 %v1793_v30  ;;  %404 = vmatprep.mubr.bf16.mxu1 %v103_v29  ;;  %v554_v29 = vld [vmem:[%s2739_s5 + $0xd0] sm:$0xff] }
  0x25   :  { %622 = vperm.xlu0 %1774, %v540_v61   ;;  %627 = vperm.xlu1 %1775, %v541_v62  }
  0x27   :  { %1712 = vmatpush3.bf16.msra.mxu1 %v1793_v30  ;;  %v555_v30 = vld [vmem:[%s2739_s5 + $0xd8] sm:$0xff] }
  0x28   :  { %1713 = vmatprep.subr.bf16.mxu1 %v1794_v33 }
  0x29   :  { %632 = vperm.xlu0 %1774, %v542_v2   ;;  %637 = vperm.xlu1 %1775, %v543_v3  }
  0x2a   :  { %309 = vmatmul.mubr.bf16.gmra.mrb[4].mxu0 %v78_v37  ;;  %405 = vmatmul.mubr.bf16.gmra.mrb[4].mxu1 %v102_v38  ;;  %v1808_v37 = vld [vmem:[%s2738_s2 + $0x40] sm:$0xff]   ;;  %v558_v38 = vld [vmem:[%s2739_s5 + $0xf0] sm:$0xff] }
  0x2b   :  { %1714 = vmatpush3.bf16.msra.mxu1 %v1794_v33  ;;  %316 = vmatprep.mubr.bf16.mxu0 %v81_v40  ;;  %v1807_v33 = vld [vmem:[%s2738_s2 + $0x38] sm:$0xff]   ;;  %v68_v40 = vld [vmem:[%s2736_s0 + $0x40] sm:$0xff] }
  0x2c   :  { %1715 = vmatprep.subr.bf16.mxu1 %v1795_v41  ;;  %412 = vmatprep.mubr.bf16.mxu1 %v105_v42  ;;  %v1809_v42 = vld [vmem:[%s2738_s2 + $0x48] sm:$0xff]   ;;  %v94_v46 = vunpack.c.h.s8.bf16 %v68_v40 }
  0x2d   :  { %642 = vperm.xlu0 %1774, %v544_v7   ;;  %647 = vperm.xlu1 %1775, %v545_v8  }
  0x2f   :  { %1716 = vmatpush3.bf16.msra.mxu1 %v1795_v41  ;;  %v92_v41 = vunpack.c.l.s8.bf16 %v68_v40 }
  0x30   :  { %1717 = vmatprep.subr.bf16.mxu1 %v1796_v47 }
  0x31   :  { %652 = vperm.xlu0 %1774, %v546_v11   ;;  %657 = vperm.xlu1 %1775, %v547_v12  }
  0x32   :  { %317 = vmatmul.mubr.bf16.gmra.mrb[8].mxu0 %v80_v48  ;;  %413 = vmatmul.mubr.bf16.gmra.mrb[8].mxu1 %v104_v49  ;;  %v97_v48 = vunpack.c.l.s8.bf16 %v71_v45  ;;  %v1812_v49 = vld [vmem:[%s2738_s2 + $0x60] sm:$0xff]  }
  0x33   :  { %1718 = vmatpush3.bf16.msra.mxu1 %v1796_v47  ;;  %324 = vmatprep.mubr.bf16.mxu0 %v83_v52  ;;  %v1811_v47 = vld [vmem:[%s2738_s2 + $0x58] sm:$0xff]   ;;  %v1813_v52 = vld [vmem:[%s2738_s2 + $0x68] sm:$0xff]  }
  0x34   :  { %1719 = vmatprep.subr.bf16.mxu1 %v1797_v53  ;;  %420 = vmatprep.mubr.bf16.mxu1 %v107_v54  ;;  %v1814_v54 = vld [vmem:[%s2738_s2 + $0x70] sm:$0xff]  }
  0x35   :  { %662 = vperm.xlu0 %1774, %v548_v16   ;;  %667 = vperm.xlu1 %1775, %v549_v17  }
  0x37   :  { %1720 = vmatpush3.bf16.msra.mxu1 %v1797_v53  ;;  %v99_v53 = vunpack.c.h.s8.bf16 %v71_v45 }
  0x38   :  { %1721 = vmatprep.subr.bf16.mxu1 %v1798_v57 }
  0x39   :  { %672 = vperm.xlu0 %1774, %v550_v20   ;;  %677 = vperm.xlu1 %1775, %v551_v21  }
  0x3a   :  { %325 = vmatmul.mubr.bf16.gmra.mrb[12].mxu0 %v82_v59  ;;  %421 = vmatmul.mubr.bf16.gmra.mrb[12].mxu1 %v106_v60 }
  0x3b   :  { %1722 = vmatpush3.bf16.msra.mxu1 %v1798_v57  ;;  %332 = vmatprep.mubr.bf16.mxu0 %v85_v63 }
  0x3c   :  { %1723 = vmatprep.subr.bf16.mxu1 %v1799_v0  ;;  %1725 = vmatprep.mubr.bf16.mxu1 %v1800_v1 }
  0x3d   :  { %682 = vperm.xlu0 %1774, %v552_v25   ;;  %687 = vperm.xlu1 %1775, %v553_v26  }
  0x3f   :  { %1724 = vmatpush3.bf16.msra.mxu1 %v1799_v0 }
  0x41   :  { %692 = vperm.xlu0 %1774, %v554_v29   ;;  %697 = vperm.xlu1 %1775, %v555_v30  }
  0x42   :  { %333 = vmatmul.mubr.bf16.gmra.mrb[16].mxu0 %v84_v5  ;;  %1726 = vmatmul.mubr.bf16.vlgmr.msra.gmra.mrb[16].mxu1 %v1801_v6 }
  0x43   :  { %340 = vmatprep.mubr.bf16.mxu0 %v87_v9  ;;  %1729 = vmatprep.mubr.bf16.mxu1 %v1802_v10 }
  0x45   :  { %702 = vperm.xlu0 %1774, %v556_v34   ;;  %707 = vperm.xlu1 %1775, %v557_v35  }
  0x49   :  { %712 = vperm.xlu0 %1774, %v558_v38   ;;  %717 = vperm.xlu1 %1775, %v559_v39  }
  0x4a   :  { %341 = vmatmul.mubr.bf16.gmra.mrb[20].mxu0 %v86_v14  ;;  %1730 = vmatmul.mubr.bf16.gmra.mrb[20].mxu1 %v1803_v15 }
  0x4b   :  { %348 = vmatprep.mubr.bf16.mxu0 %v89_v18  ;;  %1733 = vmatprep.mubr.bf16.mxu1 %v1804_v19 }
  0x52   :  { %349 = vmatmul.mubr.bf16.gmra.mrb[24].mxu0 %v88_v23  ;;  %1734 = vmatmul.mubr.bf16.gmra.mrb[24].mxu1 %v1805_v24 }
  0x53   :  { %356 = vmatprep.mubr.bf16.mxu0 %v91_v27  ;;  %1737 = vmatprep.mubr.bf16.mxu1 %v1806_v28 }
  0x5a   :  { %357 = vmatmul.mubr.bf16.gmra.mrb[28].mxu0 %v90_v32  ;;  %1738 = vmatmul.mubr.bf16.gmra.mrb[28].mxu1 %v1807_v33 }
  0x5b   :  { %364 = vmatprep.mubr.bf16.mxu0 %v93_v36  ;;  %1741 = vmatprep.mubr.bf16.mxu1 %v1808_v37 }
  0x62   :  { %365 = vmatmul.mubr.bf16.gmra.mrb[32].mxu0 %v92_v41  ;;  %1742 = vmatmul.mubr.bf16.gmra.mrb[32].mxu1 %v1809_v42 }
  0x63   :  { %372 = vmatprep.mubr.bf16.mxu0 %v95_v43  ;;  %1745 = vmatprep.mubr.bf16.mxu1 %v1810_v44 }
  0x6a   :  { %373 = vmatmul.mubr.bf16.gmra.mrb[36].mxu0 %v94_v46  ;;  %1746 = vmatmul.mubr.bf16.gmra.mrb[36].mxu1 %v1811_v47 }
  0x6b   :  { %380 = vmatprep.mubr.bf16.mxu0 %v97_v48  ;;  %1749 = vmatprep.mubr.bf16.mxu1 %v1812_v49 }
  0x72   :  { %381 = vmatmul.mubr.bf16.gmra.mrb[40].mxu0 %v96_v51  ;;  %1750 = vmatmul.mubr.bf16.gmra.mrb[40].mxu1 %v1813_v52 }
  0x73   :  { %388 = vmatprep.mubr.bf16.mxu0 %v99_v53  ;;  %1753 = vmatprep.mubr.bf16.mxu1 %v1814_v54 }
  0x7a   :  { %389 = vmatmul.mubr.bf16.gmra.mrb[44].mxu0 %v98_v55  ;;  %1754 = vmatmul.mubr.bf16.gmra.mrb[44].mxu1 %v1815_v56 }
  0x89   :  { %v2246_v58 = vpop.permute.xlu1 %572 }
  0x8c   :  { %v2244_v57 = vpop.permute.xlu0 %562 }
  0x8d   :  { %v2250_v60 = vpop.permute.xlu1 %577 }
  0x90   :  { %v2248_v59 = vpop.permute.xlu0 %567 }
  0x91   :  { %v2254_v62 = vpop.permute.xlu1 %587 }
  0x94   :  { %v2252_v61 = vpop.permute.xlu0 %582 }
  0x95   :  { %v2258_v0 = vpop.permute.xlu1 %597 }
  0x98   :  { %v2256_v63 = vpop.permute.xlu0 %592 }
  0x99   :  { %v2262_v2 = vpop.permute.xlu1 %607 }
  0x9c   :  { %v2260_v1 = vpop.permute.xlu0 %602 }
  0x9d   :  { %v2270_v16 = vpop.permute.xlu1 %617 }
  0xa0   :  { %v2268_v15 = vpop.permute.xlu0 %612 }
  0xa4   :  { %v2276_v29 = vpop.permute.xlu0 %622  ;;  %v2278_v30 = vpop.permute.xlu1 %627 }
  0xa8   :  { %v2284_v43 = vpop.permute.xlu0 %632  ;;  %v2286_v44 = vpop.permute.xlu1 %637 }
  0xf5   :  { %v1589_v3 = vpop.f32.mrb[0].mxu0  ;;  %v1661_v4 = vpop.f32.mrb[0].mxu1 }
  0xf6   :  { %v1590_v5 = vpop.f32.mrb[1].mxu0  ;;  %v1662_v6 = vpop.f32.mrb[1].mxu1 }
  0xf7   :  { %v1591_v7 = vadd.f32 %v1590_v5, %v1589_v3  ;;  %v2264_v8 = vadd.f32 %v1662_v6, %v1661_v4  ;;  %v1592_v9 = vpop.f32.mrb[2].mxu0  ;;  %v1664_v10 = vpop.f32.mrb[2].mxu1 }
  0xf8   :  { %v1593_v11 = vpop.f32.mrb[3].mxu0  ;;  %v1665_v12 = vpop.f32.mrb[3].mxu1 }
  0xf9   :  { %v1594_v13 = vadd.f32 %v1593_v11, %v1592_v9  ;;  %v2266_v14 = vadd.f32 %v1665_v12, %v1664_v10  ;;  %v2292_v3 = vpop.permute.xlu0 %642  ;;  %v2294_v4 = vpop.permute.xlu1 %647  ;;  %v720_v10 = vmul.f32 %v1591_v7, %v2244_v57  ;;  %v2301_v11 = vld [vmem:[%s2740_s4] ss:$0 sm:$0xff] }
  0xfd   :  { %v1595_v17 = vpop.f32.mrb[4].mxu0  ;;  %v1667_v18 = vpop.f32.mrb[4].mxu1 }
  0xfe   :  { %v1596_v19 = vpop.f32.mrb[5].mxu0  ;;  %v1668_v20 = vpop.f32.mrb[5].mxu1 }
  0xff   :  { %v1597_v21 = vadd.f32 %v1596_v19, %v1595_v17  ;;  %v2272_v22 = vadd.f32 %v1668_v20, %v1667_v18  ;;  %v1598_v23 = vpop.f32.mrb[6].mxu0  ;;  %v1670_v24 = vpop.f32.mrb[6].mxu1 }
 0x100   :  { %v1599_v25 = vpop.f32.mrb[7].mxu0  ;;  %v1671_v26 = vpop.f32.mrb[7].mxu1 }
 0x101   :  { %v1600_v27 = vadd.f32 %v1599_v25, %v1598_v23  ;;  %v2274_v28 = vadd.f32 %v1671_v26, %v1670_v24  ;;  %v722_v5 = vmul.f32 %v1597_v21, %v2246_v58  ;;  %v721_v58 = vmul.f32 %v1594_v13, %v2248_v59 }
 0x103   :  { %v723_v19 = vmul.f32 %v1600_v27, %v2250_v60  ;;  %v2312_v60 = vpop.permute.xlu0 %652  ;;  %v2314_v27 = vpop.permute.xlu1 %657 }
 0x105   :  { %v1601_v31 = vpop.f32.mrb[8].mxu0  ;;  %v1673_v32 = vpop.f32.mrb[8].mxu1 }
 0x106   :  { %v1602_v33 = vpop.f32.mrb[9].mxu0  ;;  %v1674_v34 = vpop.f32.mrb[9].mxu1 }
 0x107   :  { %v1603_v35 = vadd.f32 %v1602_v33, %v1601_v31  ;;  %v2280_v36 = vadd.f32 %v1674_v34, %v1673_v32  ;;  %v1604_v37 = vpop.f32.mrb[10].mxu0  ;;  %v1676_v38 = vpop.f32.mrb[10].mxu1 }
 0x108   :  { %v1605_v39 = vpop.f32.mrb[11].mxu0  ;;  %v1677_v40 = vpop.f32.mrb[11].mxu1 }
 0x109   :  { %v1606_v41 = vadd.f32 %v1605_v39, %v1604_v37  ;;  %v2282_v42 = vadd.f32 %v1677_v40, %v1676_v38  ;;  %v724_v38 = vmul.f32 %v1603_v35, %v2252_v61 }
 0x10d   :  { %v1607_v45 = vpop.f32.mrb[12].mxu0  ;;  %v1679_v46 = vpop.f32.mrb[12].mxu1 }
 0x10e   :  { %v1608_v47 = vpop.f32.mrb[13].mxu0  ;;  %v1680_v48 = vpop.f32.mrb[13].mxu1 }
 0x10f   :  { %v1609_v49 = vadd.f32 %v1608_v47, %v1607_v45  ;;  %v2288_v50 = vadd.f32 %v1680_v48, %v1679_v46  ;;  %v1610_v51 = vpop.f32.mrb[14].mxu0  ;;  %v1682_v52 = vpop.f32.mrb[14].mxu1 }
 0x110   :  { %v1611_v53 = vpop.f32.mrb[15].mxu0  ;;  %v1683_v54 = vpop.f32.mrb[15].mxu1 }
 0x111   :  { %v1612_v55 = vadd.f32 %v1611_v53, %v1610_v51  ;;  %v2290_v56 = vadd.f32 %v1683_v54, %v1682_v52  ;;  %v726_v34 = vmul.f32 %v1609_v49, %v2256_v63  ;;  %v725_v49 = vmul.f32 %v1606_v41, %v2254_v62 }
 0x113   :  { %v727_v46 = vmul.f32 %v1612_v55, %v2258_v0  ;;  %v2333_v0 = vpop.permute.xlu0 %662  ;;  %v2335_v55 = vpop.permute.xlu1 %667 }
 0x115   :  { %v1613_v6 = vpop.f32.mrb[16].mxu0  ;;  %v1727_v9 = vpop.f32.mrb[16].mxu1 }
 0x116   :  { %v1107_v12 = vadd.f32 %v1727_v9, %v722_v5  ;;  %v1614_v17 = vpop.f32.mrb[17].mxu0  ;;  %v978_v18 = vpop.f32.mrb[17].mxu1 }
 0x117   :  { %v1615_v20 = vadd.f32 %v1614_v17, %v1613_v6  ;;  %v1105_v23 = vadd.f32 %v978_v18, %v720_v10  ;;  %v1616_v24 = vpop.f32.mrb[18].mxu0  ;;  %v1728_v25 = vpop.f32.mrb[18].mxu1 }
 0x118   :  { %v1108_v21 = vadd.f32 %v1728_v25, %v723_v19  ;;  %v1617_v26 = vpop.f32.mrb[19].mxu0  ;;  %v981_v31 = vpop.f32.mrb[19].mxu1  ;;  %v2306_v57 = vadd.f32 %v2301_v11, %v1107_v12 }
 0x119   :  { %v1618_v7 = vadd.f32 %v1617_v26, %v1616_v24  ;;  %v1106_v32 = vadd.f32 %v981_v31, %v721_v58  ;;  %v2318_v59 = vadd.f32 %v2301_v11, %v1105_v23  ;;  %v728_v17 = vmul.f32 %v1615_v20, %v2260_v1 }
 0x11a   :  { %1180 = vmax.xlane.f32.xlu0 %v2306_v57  ;;  %v2329_v61 = vadd.f32 %v2301_v11, %v1108_v21 }
 0x11b   :  { %v2310_v33 = vadd.f32 %v2301_v11, %v1106_v32  ;;  %v729_v26 = vmul.f32 %v1618_v7, %v2262_v2 }
 0x11d   :  { %v1619_v13 = vpop.f32.mrb[20].mxu0  ;;  %v1731_v37 = vpop.f32.mrb[20].mxu1  ;;  %1178 = vmax.xlane.f32.xlu1 %v2310_v33 }
 0x11e   :  { %v1111_v39 = vadd.f32 %v1731_v37, %v726_v34  ;;  %v1620_v40 = vpop.f32.mrb[21].mxu0  ;;  %v994_v45 = vpop.f32.mrb[21].mxu1  ;;  %1176 = vmax.xlane.f32.xlu0 %v2318_v59 }
 0x11f   :  { %v1621_v47 = vadd.f32 %v1620_v40, %v1619_v13  ;;  %v1109_v48 = vadd.f32 %v994_v45, %v724_v38  ;;  %v1622_v51 = vpop.f32.mrb[22].mxu0  ;;  %v1732_v63 = vpop.f32.mrb[22].mxu1 }
 0x120   :  { %v1112_v52 = vadd.f32 %v1732_v63, %v727_v46  ;;  %v1623_v53 = vpop.f32.mrb[23].mxu0  ;;  %v997_v54 = vpop.f32.mrb[23].mxu1  ;;  %v2326_v5 = vadd.f32 %v2301_v11, %v1111_v39 }
 0x121   :  { %v1624_v35 = vadd.f32 %v1623_v53, %v1622_v51  ;;  %v1110_v6 = vadd.f32 %v997_v54, %v725_v49  ;;  %v730_v62 = vmul.f32 %v1621_v47, %v2268_v15  ;;  %v2339_v41 = vadd.f32 %v2301_v11, %v1109_v48  ;;  %v2359_v38 = vpop.permute.xlu1 %677 }
 0x122   :  { %1188 = vmax.xlane.f32.xlu1 %v2326_v5  ;;  %1182 = vmax.xlane.f32.xlu0 %v2329_v61  ;;  %v2342_v9 = vadd.f32 %v2301_v11, %v1112_v52 }
 0x123   :  { %v731_v24 = vmul.f32 %v1624_v35, %v2270_v16  ;;  %v2353_v20 = vadd.f32 %v2301_v11, %v1110_v6  ;;  %v2357_v16 = vpop.permute.xlu0 %672 }
 0x125   :  { %v1625_v10 = vpop.f32.mrb[24].mxu0  ;;  %v1735_v12 = vpop.f32.mrb[24].mxu1 }
 0x126   :  { %v1115_v18 = vadd.f32 %v1735_v12, %v730_v62  ;;  %v1626_v19 = vpop.f32.mrb[25].mxu0  ;;  %v1010_v23 = vpop.f32.mrb[25].mxu1  ;;  %1184 = vmax.xlane.f32.xlu1 %v2339_v41  ;;  %1190 = vmax.xlane.f32.xlu0 %v2342_v9 }
 0x127   :  { %v1627_v15 = vadd.f32 %v1626_v19, %v1625_v10  ;;  %v1113_v25 = vadd.f32 %v1010_v23, %v728_v17  ;;  %v1628_v58 = vpop.f32.mrb[26].mxu0  ;;  %v1736_v21 = vpop.f32.mrb[26].mxu1 }
 0x128   :  { %v1116_v31 = vadd.f32 %v1736_v21, %v731_v24  ;;  %v1629_v32 = vpop.f32.mrb[27].mxu0  ;;  %v1013_v34 = vpop.f32.mrb[27].mxu1  ;;  %v2350_v1 = vadd.f32 %v2301_v11, %v1115_v18 }
 0x129   :  { %v1630_v13 = vadd.f32 %v1629_v32, %v1628_v58  ;;  %v1114_v37 = vadd.f32 %v1013_v34, %v729_v26  ;;  %v2362_v2 = vadd.f32 %v2301_v11, %v1113_v25  ;;  %v732_v45 = vmul.f32 %v1627_v15, %v2276_v29  ;;  %v683_v18 = vpop.permute.xlu0 %682  ;;  %v688_v19 = vpop.permute.xlu1 %687 }
 0x12a   :  { %1196 = vmax.xlane.f32.xlu1 %v2350_v1  ;;  %1186 = vmax.xlane.f32.xlu0 %v2353_v20  ;;  %v2365_v7 = vadd.f32 %v2301_v11, %v1116_v31 }
 0x12b   :  { %v733_v52 = vmul.f32 %v1630_v13, %v2278_v30  ;;  %v2372_v35 = vadd.f32 %v2301_v11, %v1114_v37 }
 0x12d   :  { %v1631_v39 = vpop.f32.mrb[28].mxu0  ;;  %v1739_v40 = vpop.f32.mrb[28].mxu1 }
 0x12e   :  { %v1632_v46 = vpop.f32.mrb[29].mxu0  ;;  %v1026_v47 = vpop.f32.mrb[29].mxu1  ;;  %1192 = vmax.xlane.f32.xlu1 %v2362_v2  ;;  %1198 = vmax.xlane.f32.xlu0 %v2365_v7 }
 0x12f   :  { %v1633_v48 = vadd.f32 %v1632_v46, %v1631_v39  ;;  %v1117_v51 = vadd.f32 %v1026_v47, %v732_v45  ;;  %v1634_v63 = vpop.f32.mrb[30].mxu0  ;;  %v1740_v49 = vpop.f32.mrb[30].mxu1 }
 0x130   :  { %v1635_v53 = vpop.f32.mrb[31].mxu0  ;;  %v1029_v54 = vpop.f32.mrb[31].mxu1 }
 0x131   :  { %v734_v6 = vmul.f32 %v1633_v48, %v2284_v43  ;;  %v1636_v29 = vadd.f32 %v1635_v53, %v1634_v63  ;;  %v1118_v62 = vadd.f32 %v1029_v54, %v733_v52  ;;  %v2376_v10 = vadd.f32 %v2301_v11, %v1117_v51  ;;  %v693_v45 = vpop.permute.xlu0 %692  ;;  %v698_v46 = vpop.permute.xlu1 %697 }
 0x132   :  { %1194 = vmax.xlane.f32.xlu0 %v2372_v35 }
 0x133   :  { %v735_v12 = vmul.f32 %v1636_v29, %v2286_v44  ;;  %1200 = vmax.xlane.f32.xlu1 %v2376_v10  ;;  %v2382_v30 = vadd.f32 %v2301_v11, %v1118_v62  ;;  %v1119_v17 = vadd.f32 %v1739_v40, %v734_v6 }
 0x135   :  { %v1637_v23 = vpop.f32.mrb[32].mxu0  ;;  %v1743_v24 = vpop.f32.mrb[32].mxu1  ;;  %v2385_v43 = vadd.f32 %v2301_v11, %v1119_v17  ;;  %v1120_v15 = vadd.f32 %v1740_v49, %v735_v12 }
 0x136   :  { %v1638_v25 = vpop.f32.mrb[33].mxu0  ;;  %v1042_v58 = vpop.f32.mrb[33].mxu1  ;;  %1202 = vmax.xlane.f32.xlu0 %v2382_v30 }
 0x137   :  { %v1639_v21 = vadd.f32 %v1638_v25, %v1637_v23  ;;  %v1640_v44 = vpop.f32.mrb[34].mxu0  ;;  %v1744_v26 = vpop.f32.mrb[34].mxu1  ;;  %1204 = vmax.xlane.f32.xlu1 %v2385_v43  ;;  %v2390_v31 = vadd.f32 %v2301_v11, %v1120_v15  ;;  %v746_v15 = vmul.f32 %v2272_v22, %v693_v45 }
 0x138   :  { %v1641_v32 = vpop.f32.mrb[35].mxu0  ;;  %v1045_v34 = vpop.f32.mrb[35].mxu1 }
 0x139   :  { %v736_v13 = vmul.f32 %v1639_v21, %v2292_v3  ;;  %v1642_v37 = vadd.f32 %v1641_v32, %v1640_v44  ;;  %v703_v25 = vpop.permute.xlu0 %702  ;;  %v744_v21 = vmul.f32 %v2264_v8, %v683_v18 }
 0x13a   :  { %1206 = vmax.xlane.f32.xlu0 %v2390_v31 }
 0x13b   :  { %v1121_v39 = vadd.f32 %v1042_v58, %v736_v13  ;;  %v737_v40 = vmul.f32 %v1642_v37, %v2294_v4  ;;  %v708_v58 = vpop.permute.xlu1 %707 }
 0x13d   :  { %v1122_v47 = vadd.f32 %v1045_v34, %v737_v40  ;;  %v1643_v48 = vpop.f32.mrb[36].mxu0  ;;  %v2395_v51 = vpop.f32.mrb[36].mxu1  ;;  %v2398_v63 = vadd.f32 %v2301_v11, %v1121_v39 }
 0x13e   :  { %v1644_v49 = vpop.f32.mrb[37].mxu0  ;;  %v1058_v52 = vpop.f32.mrb[37].mxu1 }
 0x13f   :  { %v1645_v53 = vadd.f32 %v1644_v49, %v1643_v48  ;;  %v1646_v54 = vpop.f32.mrb[38].mxu0  ;;  %v2400_v3 = vpop.f32.mrb[38].mxu1  ;;  %1208 = vmax.xlane.f32.xlu1 %v2398_v63  ;;  %v2404_v6 = vadd.f32 %v2301_v11, %v1122_v47 }
 0x140   :  { %v1647_v4 = vpop.f32.mrb[39].mxu0  ;;  %v1061_v29 = vpop.f32.mrb[39].mxu1 }
 0x141   :  { %v738_v62 = vmul.f32 %v1645_v53, %v2312_v60  ;;  %v1648_v12 = vadd.f32 %v1647_v4, %v1646_v54  ;;  %1210 = vmax.xlane.f32.xlu0 %v2404_v6  ;;  %v747_v60 = vmul.f32 %v2274_v28, %v698_v46  ;;  %v713_v28 = vpop.permute.xlu0 %712  ;;  %v718_v54 = vpop.permute.xlu1 %717 }
 0x143   :  { %v739_v17 = vmul.f32 %v1648_v12, %v2314_v27  ;;  %v1123_v23 = vadd.f32 %v1743_v24, %v738_v62  ;;  %v745_v27 = vmul.f32 %v2266_v14, %v688_v19  ;;  %v750_v12 = vmul.f32 %v2288_v50, %v713_v28 }
 0x145   :  { %v1649_v44 = vpop.f32.mrb[40].mxu0  ;;  %v1751_v32 = vpop.f32.mrb[40].mxu1  ;;  %v2412_v34 = vadd.f32 %v2301_v11, %v1123_v23  ;;  %v1124_v13 = vadd.f32 %v1744_v26, %v739_v17  ;;  %v748_v17 = vmul.f32 %v2280_v36, %v703_v25 }
 0x146   :  { %v1131_v37 = vadd.f32 %v1751_v32, %v746_v15  ;;  %v1650_v39 = vpop.f32.mrb[41].mxu0  ;;  %v1074_v40 = vpop.f32.mrb[41].mxu1 }
 0x147   :  { %v1651_v24 = vadd.f32 %v1650_v39, %v1649_v44  ;;  %v1129_v47 = vadd.f32 %v1074_v40, %v744_v21  ;;  %v1652_v22 = vpop.f32.mrb[42].mxu0  ;;  %v1752_v45 = vpop.f32.mrb[42].mxu1  ;;  %1212 = vmax.xlane.f32.xlu1 %v2412_v34  ;;  %v2418_v8 = vadd.f32 %v2301_v11, %v1124_v13  ;;  %v751_v44 = vmul.f32 %v2290_v56, %v718_v54 }
 0x148   :  { %v1132_v18 = vadd.f32 %v1752_v45, %v747_v60  ;;  %v1653_v48 = vpop.f32.mrb[43].mxu0  ;;  %v1077_v49 = vpop.f32.mrb[43].mxu1  ;;  %v2421_v26 = vadd.f32 %v2301_v11, %v1131_v37  ;;  %v749_v60 = vmul.f32 %v2282_v42, %v708_v58 }
 0x149   :  { %v740_v46 = vmul.f32 %v1651_v24, %v2333_v0  ;;  %v1654_v53 = vadd.f32 %v1653_v48, %v1652_v22  ;;  %v1130_v14 = vadd.f32 %v1077_v49, %v745_v27  ;;  %1214 = vmax.xlane.f32.xlu0 %v2418_v8  ;;  %v2434_v0 = vadd.f32 %v2301_v11, %v1129_v47 }
 0x14a   :  { %v2426_v19 = vadd.f32 %v2301_v11, %v1132_v18 }
 0x14b   :  { %v741_v4 = vmul.f32 %v1654_v53, %v2335_v55  ;;  %1228 = vmax.xlane.f32.xlu1 %v2421_v26  ;;  %v1125_v62 = vadd.f32 %v1058_v52, %v740_v46  ;;  %v2440_v36 = vadd.f32 %v2301_v11, %v1130_v14 }
 0x14d   :  { %v1655_v23 = vpop.f32.mrb[44].mxu0  ;;  %v1755_v15 = vpop.f32.mrb[44].mxu1  ;;  %1230 = vmax.xlane.f32.xlu0 %v2426_v19  ;;  %v1126_v21 = vadd.f32 %v1061_v29, %v741_v4  ;;  %v2448_v42 = vadd.f32 %v2301_v11, %v1125_v62 }
 0x14e   :  { %v1135_v32 = vadd.f32 %v1755_v15, %v750_v12  ;;  %v1656_v13 = vpop.f32.mrb[45].mxu0  ;;  %v1090_v55 = vpop.f32.mrb[45].mxu1 }
 0x14f   :  { %v1657_v52 = vadd.f32 %v1656_v13, %v1655_v23  ;;  %v1133_v37 = vadd.f32 %v1090_v55, %v748_v17  ;;  %v1658_v50 = vpop.f32.mrb[46].mxu0  ;;  %v1756_v39 = vpop.f32.mrb[46].mxu1  ;;  %1224 = vmax.xlane.f32.xlu1 %v2434_v0  ;;  %v2456_v45 = vadd.f32 %v2301_v11, %v1126_v21 }
 0x150   :  { %v1136_v25 = vadd.f32 %v1756_v39, %v751_v44  ;;  %v1659_v40 = vpop.f32.mrb[47].mxu0  ;;  %v1093_v27 = vpop.f32.mrb[47].mxu1  ;;  %v2443_v29 = vadd.f32 %v2301_v11, %v1135_v32 }
 0x151   :  { %v742_v56 = vmul.f32 %v1657_v52, %v2357_v16  ;;  %v1660_v24 = vadd.f32 %v1659_v40, %v1658_v50  ;;  %v1134_v47 = vadd.f32 %v1093_v27, %v749_v60  ;;  %1226 = vmax.xlane.f32.xlu0 %v2440_v36  ;;  %v2461_v16 = vadd.f32 %v2301_v11, %v1133_v37 }
 0x152   :  { %v2451_v58 = vadd.f32 %v2301_v11, %v1136_v25 }
 0x153   :  { %v743_v22 = vmul.f32 %v1660_v24, %v2359_v38  ;;  %1216 = vmax.xlane.f32.xlu1 %v2448_v42  ;;  %v1127_v18 = vadd.f32 %v2395_v51, %v742_v56  ;;  %v2469_v38 = vadd.f32 %v2301_v11, %v1134_v47 }
 0x155   :  { %1218 = vmax.xlane.f32.xlu0 %v2456_v45  ;;  %v2464_v48 = vadd.f32 %v2301_v11, %v1127_v18  ;;  %v1128_v49 = vadd.f32 %v2400_v3, %v743_v22 }
 0x157   :  { %1232 = vmax.xlane.f32.xlu1 %v2461_v16  ;;  %v2472_v28 = vadd.f32 %v2301_v11, %v1128_v49 }
 0x159   :  { %1234 = vmax.xlane.f32.xlu0 %v2469_v38 }
 0x15b   :  { %1220 = vmax.xlane.f32.xlu1 %v2464_v48 }
 0x15d   :  { %1222 = vmax.xlane.f32.xlu0 %v2472_v28 }
 0x15f   :  { %1236 = vmax.xlane.f32.xlu1 %v2443_v29 }
 0x161   :  { %1238 = vmax.xlane.f32.xlu0 %v2451_v58 }
 0x1a7   :  { %v1181_v51 = vpop.xlane.xlu0 %1180 }
 0x1a8   :  { %v2480_v3 = vsub.f32 %v2306_v57, %v1181_v51 }
 0x1aa   :  { %v1276_v46 = vmul.f32 1.442695, %v2480_v3  ;;  %v1179_v53 = vpop.xlane.xlu1 %1178 }
 0x1ab   :  { %v1177_v14 = vpop.xlane.xlu0 %1176  ;;  %v2494_v57 = vsub.f32 %v2310_v33, %v1179_v53 }
 0x1ac   :  { %1816 = vpow2.f32 %v1276_v46  ;;  %v2484_v11 = vsub.f32 %v2318_v59, %v1177_v14 }
 0x1ad   :  { %v1274_v32 = vmul.f32 1.442695, %v2494_v57 }
 0x1ae   :  { %v1272_v54 = vmul.f32 1.442695, %v2484_v11 }
 0x1af   :  { %v1189_v4 = vpop.xlane.xlu1 %1188  ;;  %v1183_v62 = vpop.xlane.xlu0 %1182 }
 0x1b0   :  { %1818 = vpow2.f32 %v1272_v54  ;;  %v2488_v12 = vsub.f32 %v2326_v5, %v1189_v4  ;;  %v2491_v17 = vsub.f32 %v2329_v61, %v1183_v62 }
 0x1b2   :  { %v1284_v23 = vmul.f32 1.442695, %v2488_v12  ;;  %v1278_v15 = vmul.f32 1.442695, %v2491_v17 }
 0x1b3   :  { %v1185_v59 = vpop.xlane.xlu1 %1184  ;;  %v1191_v21 = vpop.xlane.xlu0 %1190 }
 0x1b4   :  { %1820 = vpow2.f32 %v1284_v23  ;;  %v2499_v44 = vsub.f32 %v2339_v41, %v1185_v59  ;;  %v2503_v5 = vsub.f32 %v2342_v9, %v1191_v21 }
 0x1b5   :  { %1822 = vpow2.f32 %v1278_v15 }
 0x1b6   :  { %v1817_v61 = vpop.eup %1816  ;;  %v1280_v33 = vmul.f32 1.442695, %v2499_v44  ;;  %v1286_v41 = vmul.f32 1.442695, %v2503_v5 }
 0x1b7   :  { %1340 = vadd.xlane.f32.xlu1 %v1817_v61  ;;  %v1197_v13 = vpop.xlane.xlu1 %1196  ;;  %v1187_v55 = vpop.xlane.xlu0 %1186 }
 0x1b8   :  { %1824 = vpow2.f32 %v1280_v33  ;;  %v2507_v60 = vsub.f32 %v2350_v1, %v1197_v13  ;;  %v2511_v52 = vsub.f32 %v2353_v20, %v1187_v55 }
 0x1b9   :  { %1826 = vpow2.f32 %v1274_v32 }
 0x1ba   :  { %v1819_v37 = vpop.eup %1818  ;;  %v1292_v9 = vmul.f32 1.442695, %v2507_v60  ;;  %v1282_v1 = vmul.f32 1.442695, %v2511_v52 }
 0x1bb   :  { %v1193_v50 = vpop.xlane.xlu1 %1192  ;;  %1336 = vadd.xlane.f32.xlu1 %v1819_v37  ;;  %v1199_v39 = vpop.xlane.xlu0 %1198 }
 0x1bc   :  { %1828 = vpow2.f32 %v1292_v9  ;;  %v2515_v25 = vsub.f32 %v2362_v2, %v1193_v50  ;;  %v2518_v40 = vsub.f32 %v2365_v7, %v1199_v39 }
 0x1bd   :  { %1830 = vpow2.f32 %v1286_v41 }
 0x1be   :  { %v1821_v27 = vpop.eup %1820  ;;  %v1288_v20 = vmul.f32 1.442695, %v2515_v25  ;;  %v1294_v47 = vmul.f32 1.442695, %v2518_v40 }
 0x1bf   :  { %v1823_v56 = vpop.eup %1822  ;;  %1348 = vadd.xlane.f32.xlu1 %v1821_v27  ;;  %v1195_v24 = vpop.xlane.xlu0 %1194 }
 0x1c0   :  { %1832 = vpow2.f32 %v1288_v20  ;;  %1342 = vadd.xlane.f32.xlu0 %v1823_v56  ;;  %v2524_v22 = vsub.f32 %v2372_v35, %v1195_v24  ;;  %v1201_v2 = vpop.xlane.xlu1 %1200 }
 0x1c1   :  { %1834 = vpow2.f32 %v1282_v1  ;;  %v2527_v7 = vsub.f32 %v2376_v10, %v1201_v2 }
 0x1c2   :  { %v1825_v18 = vpop.eup %1824  ;;  %1836 = vpow2.f32 %v1294_v47  ;;  %v1290_v53 = vmul.f32 1.442695, %v2524_v22 }
 0x1c3   :  { %v1827_v49 = vpop.eup %1826  ;;  %v1296_v51 = vmul.f32 1.442695, %v2527_v7  ;;  %1344 = vadd.xlane.f32.xlu1 %v1825_v18  ;;  %v1203_v46 = vpop.xlane.xlu0 %1202 }
 0x1c4   :  { %1338 = vadd.xlane.f32.xlu0 %v1827_v49  ;;  %v1205_v14 = vpop.xlane.xlu1 %1204  ;;  %v2532_v35 = vsub.f32 %v2382_v30, %v1203_v46 }
 0x1c5   :  { %1838 = vpow2.f32 %v1296_v51  ;;  %v2535_v54 = vsub.f32 %v2385_v43, %v1205_v14 }
 0x1c6   :  { %v1829_v10 = vpop.eup %1828  ;;  %1840 = vpow2.f32 %v1290_v53  ;;  %v1298_v59 = vmul.f32 1.442695, %v2532_v35 }
 0x1c7   :  { %v1831_v4 = vpop.eup %1830  ;;  %v1300_v62 = vmul.f32 1.442695, %v2535_v54  ;;  %1356 = vadd.xlane.f32.xlu1 %v1829_v10  ;;  %v1207_v23 = vpop.xlane.xlu0 %1206 }
 0x1c8   :  { %1350 = vadd.xlane.f32.xlu0 %v1831_v4  ;;  %v2539_v15 = vsub.f32 %v2390_v31, %v1207_v23 }
 0x1c9   :  { %1842 = vpow2.f32 %v1300_v62 }
 0x1ca   :  { %v1833_v21 = vpop.eup %1832  ;;  %v1302_v43 = vmul.f32 1.442695, %v2539_v15  ;;  %1844 = vpow2.f32 %v1298_v59 }
 0x1cb   :  { %v1835_v30 = vpop.eup %1834  ;;  %1352 = vadd.xlane.f32.xlu1 %v1833_v21 }
 0x1cc   :  { %1346 = vadd.xlane.f32.xlu0 %v1835_v30  ;;  %v1209_v32 = vpop.xlane.xlu1 %1208  ;;  %v1837_v33 = vpop.eup %1836  ;;  %1846 = vpow2.f32 %v1302_v43 }
 0x1cd   :  { %v2544_v61 = vsub.f32 %v2398_v63, %v1209_v32 }
 0x1ce   :  { %v1211_v13 = vpop.xlane.xlu0 %1210 }
 0x1cf   :  { %v1839_v55 = vpop.eup %1838  ;;  %v1304_v31 = vmul.f32 1.442695, %v2544_v61  ;;  %v2548_v41 = vsub.f32 %v2404_v6, %v1211_v13 }
 0x1d0   :  { %1358 = vadd.xlane.f32.xlu0 %v1837_v33  ;;  %1360 = vadd.xlane.f32.xlu1 %v1839_v55  ;;  %v1841_v9 = vpop.eup %1840 }
 0x1d1   :  { %1848 = vpow2.f32 %v1304_v31  ;;  %v1306_v37 = vmul.f32 1.442695, %v2548_v41 }
 0x1d3   :  { %v1843_v50 = vpop.eup %1842  ;;  %1850 = vpow2.f32 %v1306_v37 }
 0x1d4   :  { %1354 = vadd.xlane.f32.xlu0 %v1841_v9  ;;  %v1213_v63 = vpop.xlane.xlu1 %1212  ;;  %1364 = vadd.xlane.f32.xlu1 %v1843_v50  ;;  %v1845_v27 = vpop.eup %1844 }
 0x1d5   :  { %v2552_v39 = vsub.f32 %v2412_v34, %v1213_v63 }
 0x1d6   :  { %v1215_v1 = vpop.xlane.xlu0 %1214  ;;  %v1847_v2 = vpop.eup %1846 }
 0x1d7   :  { %v1308_v6 = vmul.f32 1.442695, %v2552_v39  ;;  %v2556_v20 = vsub.f32 %v2418_v8, %v1215_v1 }
 0x1d8   :  { %1362 = vadd.xlane.f32.xlu0 %v1845_v27  ;;  %v1229_v56 = vpop.xlane.xlu1 %1228 }
 0x1d9   :  { %1852 = vpow2.f32 %v1308_v6  ;;  %v1310_v24 = vmul.f32 1.442695, %v2556_v20  ;;  %v2560_v47 = vsub.f32 %v2421_v26, %v1229_v56 }
 0x1da   :  { %v1231_v18 = vpop.xlane.xlu0 %1230 }
 0x1db   :  { %v1849_v49 = vpop.eup %1848  ;;  %1854 = vpow2.f32 %v1310_v24  ;;  %v1324_v34 = vmul.f32 1.442695, %v2560_v47  ;;  %v2564_v51 = vsub.f32 %v2426_v19, %v1231_v18 }
 0x1dc   :  { %1366 = vadd.xlane.f32.xlu0 %v1847_v2  ;;  %v1225_v8 = vpop.xlane.xlu1 %1224  ;;  %1368 = vadd.xlane.f32.xlu1 %v1849_v49 }
 0x1dd   :  { %v1851_v46 = vpop.eup %1850  ;;  %1856 = vpow2.f32 %v1324_v34  ;;  %v1326_v53 = vmul.f32 1.442695, %v2564_v51  ;;  %v2568_v14 = vsub.f32 %v2434_v0, %v1225_v8 }
 0x1de   :  { %v1227_v26 = vpop.xlane.xlu0 %1226 }
 0x1df   :  { %1858 = vpow2.f32 %v1326_v53  ;;  %v1320_v10 = vmul.f32 1.442695, %v2568_v14  ;;  %v2572_v4 = vsub.f32 %v2440_v36, %v1227_v26 }
 0x1e0   :  { %1370 = vadd.xlane.f32.xlu0 %v1851_v46  ;;  %v1217_v19 = vpop.xlane.xlu1 %1216 }
 0x1e1   :  { %1860 = vpow2.f32 %v1320_v10  ;;  %v1322_v62 = vmul.f32 1.442695, %v2572_v4  ;;  %v2576_v23 = vsub.f32 %v2448_v42, %v1217_v19 }
 0x1e2   :  { %v1219_v59 = vpop.xlane.xlu0 %1218 }
 0x1e3   :  { %v1853_v21 = vpop.eup %1852  ;;  %1862 = vpow2.f32 %v1322_v62  ;;  %v1312_v0 = vmul.f32 1.442695, %v2576_v23  ;;  %v2580_v30 = vsub.f32 %v2456_v45, %v1219_v59 }
 0x1e4   :  { %v1233_v43 = vpop.xlane.xlu1 %1232  ;;  %1372 = vadd.xlane.f32.xlu1 %v1853_v21 }
 0x1e5   :  { %v1855_v36 = vpop.eup %1854  ;;  %1864 = vpow2.f32 %v1312_v0  ;;  %v1314_v32 = vmul.f32 1.442695, %v2580_v30  ;;  %v2584_v33 = vsub.f32 %v2461_v16, %v1233_v43 }
 0x1e6   :  { %1374 = vadd.xlane.f32.xlu0 %v1855_v36  ;;  %v1235_v42 = vpop.xlane.xlu0 %1234 }
 0x1e7   :  { %v1857_v13 = vpop.eup %1856  ;;  %1866 = vpow2.f32 %v1314_v32  ;;  %v1328_v55 = vmul.f32 1.442695, %v2584_v33  ;;  %v2588_v31 = vsub.f32 %v2469_v38, %v1235_v42 }
 0x1e8   :  { %v1221_v45 = vpop.xlane.xlu1 %1220  ;;  %1388 = vadd.xlane.f32.xlu1 %v1857_v13 }
 0x1e9   :  { %v1859_v37 = vpop.eup %1858  ;;  %1868 = vpow2.f32 %v1328_v55  ;;  %v1330_v9 = vmul.f32 1.442695, %v2588_v31  ;;  %v2592_v50 = vsub.f32 %v2464_v48, %v1221_v45 }
 0x1ea   :  { %1390 = vadd.xlane.f32.xlu0 %v1859_v37  ;;  %v1223_v16 = vpop.xlane.xlu0 %1222 }
 0x1eb   :  { %v1861_v63 = vpop.eup %1860  ;;  %1870 = vpow2.f32 %v1330_v9  ;;  %v1316_v1 = vmul.f32 1.442695, %v2592_v50  ;;  %v2596_v27 = vsub.f32 %v2472_v28, %v1223_v16 }
 0x1ec   :  { %v1237_v38 = vpop.xlane.xlu1 %1236  ;;  %1384 = vadd.xlane.f32.xlu1 %v1861_v63 }
 0x1ed   :  { %v1863_v6 = vpop.eup %1862  ;;  %1872 = vpow2.f32 %v1316_v1  ;;  %v1318_v56 = vmul.f32 1.442695, %v2596_v27  ;;  %v2600_v24 = vsub.f32 %v2443_v29, %v1237_v38 }
 0x1ee   :  { %1386 = vadd.xlane.f32.xlu0 %v1863_v6  ;;  %v1239_v48 = vpop.xlane.xlu0 %1238 }
 0x1ef   :  { %v1865_v2 = vpop.eup %1864  ;;  %1874 = vpow2.f32 %v1318_v56  ;;  %v1332_v18 = vmul.f32 1.442695, %v2600_v24  ;;  %v2604_v49 = vsub.f32 %v2451_v58, %v1239_v48 }
 0x1f0   :  { %1376 = vadd.xlane.f32.xlu1 %v1865_v2 }
 0x1f1   :  { %v1867_v28 = vpop.eup %1866  ;;  %1876 = vpow2.f32 %v1332_v18  ;;  %v1334_v34 = vmul.f32 1.442695, %v2604_v49 }
 0x1f2   :  { %1378 = vadd.xlane.f32.xlu0 %v1867_v28 }
 0x1f3   :  { %v1869_v8 = vpop.eup %1868  ;;  %1878 = vpow2.f32 %v1334_v34 }
 0x1f4   :  { %1392 = vadd.xlane.f32.xlu1 %v1869_v8 }
 0x1f5   :  { %v1871_v29 = vpop.eup %1870 }
 0x1f6   :  { %1394 = vadd.xlane.f32.xlu0 %v1871_v29 }
 0x1f7   :  { %v1873_v46 = vpop.eup %1872 }
 0x1f8   :  { %1380 = vadd.xlane.f32.xlu1 %v1873_v46 }
 0x1f9   :  { %v1875_v53 = vpop.eup %1874 }
 0x1fa   :  { %1382 = vadd.xlane.f32.xlu0 %v1875_v53 }
 0x1fb   :  { %v1877_v26 = vpop.eup %1876 }
 0x1fc   :  { %1396 = vadd.xlane.f32.xlu1 %v1877_v26 }
 0x1fd   :  { %v1879_v10 = vpop.eup %1878 }
 0x1fe   :  { %1398 = vadd.xlane.f32.xlu0 %v1879_v10 }
 0x244   :  { %v1341_v58 = vpop.xlane.xlu1 %1340 }
 0x245   :  { %1880 = vlog2.f32 %v1341_v58 }
 0x248   :  { %v1337_v19 = vpop.xlane.xlu1 %1336 }
 0x249   :  { %1882 = vlog2.f32 %v1337_v19 }
 0x24c   :  { %v1349_v62 = vpop.xlane.xlu1 %1348 }
 0x24d   :  { %1884 = vlog2.f32 %v1349_v62  ;;  %v1343_v59 = vpop.xlane.xlu0 %1342 }
 0x24e   :  { %1886 = vlog2.f32 %v1343_v59 }
 0x24f   :  { %v1881_v21 = vpop.eup %1880 }
 0x250   :  { %v1405_v0 = vmul.f32 0.6931472, %v1881_v21  ;;  %v1345_v43 = vpop.xlane.xlu1 %1344 }
 0x251   :  { %1888 = vlog2.f32 %v1345_v43  ;;  %v1339_v36 = vpop.xlane.xlu0 %1338 }
 0x252   :  { %v1466_v32 = vsub.f32 %v2480_v3, %v1405_v0  ;;  %1890 = vlog2.f32 %v1339_v36 }
 0x253   :  { %v1883_v42 = vpop.eup %1882 }
 0x254   :  { %1498 = vst [vmem:[%s2741_s6 + $0x10] sm:$0xff] %v1466_v32  ;;  %v1401_v13 = vmul.f32 0.6931472, %v1883_v42  ;;  %v1357_v55 = vpop.xlane.xlu1 %1356 }
 0x255   :  { %1892 = vlog2.f32 %v1357_v55  ;;  %v1351_v45 = vpop.xlane.xlu0 %1350 }
 0x256   :  { %v1464_v37 = vsub.f32 %v2484_v11, %v1401_v13  ;;  %1894 = vlog2.f32 %v1351_v45 }
 0x257   :  { %v1885_v9 = vpop.eup %1884 }
 0x258   :  { %v1887_v16 = vpop.eup %1886  ;;  %1496 = vst [vmem:[%s2741_s6] sm:$0xff] %v1464_v37  ;;  %v1413_v3 = vmul.f32 0.6931472, %v1885_v9  ;;  %v1353_v63 = vpop.xlane.xlu1 %1352 }
 0x259   :  { %v1407_v1 = vmul.f32 0.6931472, %v1887_v16  ;;  %1896 = vlog2.f32 %v1353_v63  ;;  %v1347_v38 = vpop.xlane.xlu0 %1346 }
 0x25a   :  { %v1470_v6 = vsub.f32 %v2488_v12, %v1413_v3  ;;  %1898 = vlog2.f32 %v1347_v38 }
 0x25b   :  { %v1889_v56 = vpop.eup %1888  ;;  %v1467_v48 = vsub.f32 %v2491_v17, %v1407_v1 }
 0x25c   :  { %v1891_v2 = vpop.eup %1890  ;;  %1502 = vst [vmem:[%s2741_s6 + $0x30] sm:$0xff] %v1470_v6  ;;  %v1409_v11 = vmul.f32 0.6931472, %v1889_v56 }
 0x25d   :  { %1499 = vst [vmem:[%s2741_s6 + $0x18] sm:$0xff] %v1467_v48  ;;  %v1403_v18 = vmul.f32 0.6931472, %v1891_v2  ;;  %v1359_v28 = vpop.xlane.xlu0 %1358  ;;  %v1361_v34 = vpop.xlane.xlu1 %1360 }
 0x25e   :  { %v1468_v8 = vsub.f32 %v2499_v44, %v1409_v11  ;;  %1900 = vlog2.f32 %v1359_v28 }
 0x25f   :  { %v1893_v12 = vpop.eup %1892  ;;  %v1465_v29 = vsub.f32 %v2494_v57, %v1403_v18  ;;  %1902 = vlog2.f32 %v1361_v34 }
 0x260   :  { %v1895_v17 = vpop.eup %1894  ;;  %1500 = vst [vmem:[%s2741_s6 + $0x20] sm:$0xff] %v1468_v8  ;;  %v1421_v46 = vmul.f32 0.6931472, %v1893_v12 }
 0x261   :  { %1497 = vst [vmem:[%s2741_s6 + $0x8] sm:$0xff] %v1465_v29  ;;  %v1415_v53 = vmul.f32 0.6931472, %v1895_v17  ;;  %v1355_v26 = vpop.xlane.xlu0 %1354  ;;  %v1365_v10 = vpop.xlane.xlu1 %1364 }
 0x262   :  { %v1474_v44 = vsub.f32 %v2507_v60, %v1421_v46  ;;  %1904 = vlog2.f32 %v1355_v26 }
 0x263   :  { %v1897_v58 = vpop.eup %1896  ;;  %v1471_v57 = vsub.f32 %v2503_v5, %v1415_v53  ;;  %1906 = vlog2.f32 %v1365_v10 }
 0x264   :  { %v1899_v19 = vpop.eup %1898  ;;  %1506 = vst [vmem:[%s2741_s6 + $0x50] sm:$0xff] %v1474_v44  ;;  %v1417_v62 = vmul.f32 0.6931472, %v1897_v58 }
 0x265   :  { %1503 = vst [vmem:[%s2741_s6 + $0x38] sm:$0xff] %v1471_v57  ;;  %v1411_v59 = vmul.f32 0.6931472, %v1899_v19  ;;  %v1363_v21 = vpop.xlane.xlu0 %1362 }
 0x266   :  { %v1472_v0 = vsub.f32 %v2515_v25, %v1417_v62  ;;  %1908 = vlog2.f32 %v1363_v21 }
 0x267   :  { %v1469_v60 = vsub.f32 %v2511_v52, %v1411_v59 }
 0x268   :  { %v1901_v43 = vpop.eup %1900  ;;  %1504 = vst [vmem:[%s2741_s6 + $0x40] sm:$0xff] %v1472_v0 }
 0x269   :  { %v1903_v5 = vpop.eup %1902  ;;  %1501 = vst [vmem:[%s2741_s6 + $0x28] sm:$0xff] %v1469_v60  ;;  %v1423_v36 = vmul.f32 0.6931472, %v1901_v43  ;;  %v1367_v32 = vpop.xlane.xlu0 %1366 }
 0x26a   :  { %v1369_v42 = vpop.xlane.xlu1 %1368  ;;  %v1425_v13 = vmul.f32 0.6931472, %v1903_v5  ;;  %1910 = vlog2.f32 %v1367_v32 }
 0x26b   :  { %v1475_v25 = vsub.f32 %v2518_v40, %v1423_v36  ;;  %1912 = vlog2.f32 %v1369_v42 }
 0x26c   :  { %v1905_v55 = vpop.eup %1904  ;;  %v1476_v52 = vsub.f32 %v2527_v7, %v1425_v13 }
 0x26d   :  { %v1907_v45 = vpop.eup %1906  ;;  %1507 = vst [vmem:[%s2741_s6 + $0x58] sm:$0xff] %v1475_v25  ;;  %v1419_v37 = vmul.f32 0.6931472, %v1905_v55  ;;  %v1371_v9 = vpop.xlane.xlu0 %1370 }
 0x26e   :  { %1508 = vst [vmem:[%s2741_s6 + $0x60] sm:$0xff] %v1476_v52  ;;  %v1429_v16 = vmul.f32 0.6931472, %v1907_v45  ;;  %1914 = vlog2.f32 %v1371_v9 }
 0x26f   :  { %v1473_v3 = vsub.f32 %v2524_v22, %v1419_v37 }
 0x270   :  { %v1909_v40 = vpop.eup %1908  ;;  %v1478_v63 = vsub.f32 %v2535_v54, %v1429_v16 }
 0x271   :  { %1505 = vst [vmem:[%s2741_s6 + $0x48] sm:$0xff] %v1473_v3  ;;  %v1427_v7 = vmul.f32 0.6931472, %v1909_v40  ;;  %v1373_v1 = vpop.xlane.xlu1 %1372 }
 0x272   :  { %1510 = vst [vmem:[%s2741_s6 + $0x70] sm:$0xff] %v1478_v63  ;;  %1916 = vlog2.f32 %v1373_v1 }
 0x273   :  { %v1477_v38 = vsub.f32 %v2532_v35, %v1427_v7  ;;  %v1375_v6 = vpop.xlane.xlu0 %1374 }
 0x274   :  { %v1911_v56 = vpop.eup %1910  ;;  %1918 = vlog2.f32 %v1375_v6 }
 0x275   :  { %v1913_v22 = vpop.eup %1912  ;;  %1509 = vst [vmem:[%s2741_s6 + $0x68] sm:$0xff] %v1477_v38  ;;  %v1431_v54 = vmul.f32 0.6931472, %v1911_v56  ;;  %v1389_v48 = vpop.xlane.xlu1 %1388 }
 0x276   :  { %v1433_v2 = vmul.f32 0.6931472, %v1913_v22  ;;  %1920 = vlog2.f32 %v1389_v48 }
 0x277   :  { %v1479_v11 = vsub.f32 %v2539_v15, %v1431_v54  ;;  %v1391_v18 = vpop.xlane.xlu0 %1390 }
 0x278   :  { %v1915_v28 = vpop.eup %1914  ;;  %v1480_v34 = vsub.f32 %v2544_v61, %v1433_v2  ;;  %1922 = vlog2.f32 %v1391_v18 }
 0x279   :  { %1511 = vst [vmem:[%s2741_s6 + $0x78] sm:$0xff] %v1479_v11  ;;  %v1435_v35 = vmul.f32 0.6931472, %v1915_v28  ;;  %v1385_v8 = vpop.xlane.xlu1 %1384 }
 0x27a   :  { %1512 = vst [vmem:[%s2741_s6 + $0x80] sm:$0xff] %v1480_v34  ;;  %1924 = vlog2.f32 %v1385_v8 }
 0x27b   :  { %v1481_v12 = vsub.f32 %v2548_v41, %v1435_v35  ;;  %v1387_v29 = vpop.xlane.xlu0 %1386 }
 0x27c   :  { %v1917_v15 = vpop.eup %1916  ;;  %1926 = vlog2.f32 %v1387_v29 }
 0x27d   :  { %1513 = vst [vmem:[%s2741_s6 + $0x88] sm:$0xff] %v1481_v12  ;;  %v1437_v61 = vmul.f32 0.6931472, %v1917_v15  ;;  %v1377_v17 = vpop.xlane.xlu1 %1376 }
 0x27e   :  { %v1919_v46 = vpop.eup %1918  ;;  %1928 = vlog2.f32 %v1377_v17 }
 0x27f   :  { %v1482_v53 = vsub.f32 %v2552_v39, %v1437_v61  ;;  %v1439_v26 = vmul.f32 0.6931472, %v1919_v46  ;;  %v1379_v10 = vpop.xlane.xlu0 %1378 }
 0x280   :  { %v1921_v44 = vpop.eup %1920  ;;  %1930 = vlog2.f32 %v1379_v10 }
 0x281   :  { %1514 = vst [vmem:[%s2741_s6 + $0x90] sm:$0xff] %v1482_v53  ;;  %v1483_v41 = vsub.f32 %v2556_v20, %v1439_v26  ;;  %v1453_v58 = vmul.f32 0.6931472, %v1921_v44  ;;  %v1393_v57 = vpop.xlane.xlu1 %1392 }
 0x282   :  { %v1923_v19 = vpop.eup %1922  ;;  %1932 = vlog2.f32 %v1393_v57 }
 0x283   :  { %1515 = vst [vmem:[%s2741_s6 + $0x98] sm:$0xff] %v1483_v41  ;;  %v1490_v39 = vsub.f32 %v2560_v47, %v1453_v58  ;;  %v1455_v62 = vmul.f32 0.6931472, %v1923_v19  ;;  %v1395_v59 = vpop.xlane.xlu0 %1394 }
 0x284   :  { %v1925_v21 = vpop.eup %1924  ;;  %1934 = vlog2.f32 %v1395_v59 }
 0x285   :  { %1522 = vst [vmem:[%s2741_s6 + $0xd0] sm:$0xff] %v1490_v39  ;;  %v1491_v20 = vsub.f32 %v2564_v51, %v1455_v62  ;;  %v1449_v0 = vmul.f32 0.6931472, %v1925_v21  ;;  %v1381_v60 = vpop.xlane.xlu1 %1380 }
 0x286   :  { %v1927_v43 = vpop.eup %1926  ;;  %1936 = vlog2.f32 %v1381_v60 }
 0x287   :  { %1523 = vst [vmem:[%s2741_s6 + $0xd8] sm:$0xff] %v1491_v20  ;;  %v1488_v47 = vsub.f32 %v2568_v14, %v1449_v0  ;;  %v1451_v5 = vmul.f32 0.6931472, %v1927_v43  ;;  %v1383_v36 = vpop.xlane.xlu0 %1382 }
 0x288   :  { %v1929_v32 = vpop.eup %1928  ;;  %1938 = vlog2.f32 %v1383_v36 }
 0x289   :  { %1520 = vst [vmem:[%s2741_s6 + $0xc0] sm:$0xff] %v1488_v47  ;;  %v1489_v51 = vsub.f32 %v2572_v4, %v1451_v5  ;;  %v1441_v42 = vmul.f32 0.6931472, %v1929_v32  ;;  %v1397_v13 = vpop.xlane.xlu1 %1396 }
 0x28a   :  { %v1931_v25 = vpop.eup %1930  ;;  %1940 = vlog2.f32 %v1397_v13 }
 0x28b   :  { %1521 = vst [vmem:[%s2741_s6 + $0xc8] sm:$0xff] %v1489_v51  ;;  %v1484_v14 = vsub.f32 %v2576_v23, %v1441_v42  ;;  %v1443_v55 = vmul.f32 0.6931472, %v1931_v25  ;;  %v1399_v52 = vpop.xlane.xlu0 %1398 }
 0x28c   :  { %v1933_v45 = vpop.eup %1932  ;;  %1942 = vlog2.f32 %v1399_v52 }
 0x28d   :  { %1516 = vst [vmem:[%s2741_s6 + $0xa0] sm:$0xff] %v1484_v14  ;;  %v1485_v4 = vsub.f32 %v2580_v30, %v1443_v55  ;;  %v1457_v37 = vmul.f32 0.6931472, %v1933_v45 }
 0x28e   :  { %v1935_v9 = vpop.eup %1934 }
 0x28f   :  { %1517 = vst [vmem:[%s2741_s6 + $0xa8] sm:$0xff] %v1485_v4  ;;  %v1492_v16 = vsub.f32 %v2584_v33, %v1457_v37  ;;  %v1459_v3 = vmul.f32 0.6931472, %v1935_v9 }
 0x290   :  { %v1937_v23 = vpop.eup %1936 }
 0x291   :  { %1524 = vst [vmem:[%s2741_s6 + $0xe0] sm:$0xff] %v1492_v16  ;;  %v1493_v40 = vsub.f32 %v2588_v31, %v1459_v3  ;;  %v1445_v63 = vmul.f32 0.6931472, %v1937_v23 }
 0x292   :  { %v1939_v7 = vpop.eup %1938 }
 0x293   :  { %1525 = vst [vmem:[%s2741_s6 + $0xe8] sm:$0xff] %v1493_v40  ;;  %v1486_v30 = vsub.f32 %v2592_v50, %v1445_v63  ;;  %v1447_v1 = vmul.f32 0.6931472, %v1939_v7 }
 0x294   :  { %v1941_v38 = vpop.eup %1940 }
 0x295   :  { %1518 = vst [vmem:[%s2741_s6 + $0xb0] sm:$0xff] %v1486_v30  ;;  %v1487_v33 = vsub.f32 %v2596_v27, %v1447_v1  ;;  %v1461_v6 = vmul.f32 0.6931472, %v1941_v38 }
 0x296   :  { %v1943_v56 = vpop.eup %1942 }
 0x297   :  { %1519 = vst [vmem:[%s2741_s6 + $0xb8] sm:$0xff] %v1487_v33  ;;  %v1494_v31 = vsub.f32 %v2600_v24, %v1461_v6  ;;  %v1463_v22 = vmul.f32 0.6931472, %v1943_v56 }
 0x299   :  { %1526 = vst [vmem:[%s2741_s6 + $0xf0] sm:$0xff] %v1494_v31  ;;  %v1495_v50 = vsub.f32 %v2604_v49, %v1463_v22 }
 0x29b   :  { %1527 = vst [vmem:[%s2741_s6 + $0xf8] sm:$0xff] %v1495_v50 }

</bundles_post_ra>
